<compile_context>
chip_gen: v5e
topology: v5e:2x2
jax: 0.10.0
libtpu: 0.0.40
codegen_flags: <defaults>
</compile_context>

<pallas_src>
import functools

import jax
import jax.numpy as jnp
from jax.experimental import pallas as pl
from jax.experimental.pallas import tpu as pltpu

# ---------------- synthetic small config (structure of CLIP ViT-B/32 text) ---
VOCAB = 64          # (real: 49408)
CONTEXT_LEN = 16    # (real: 77 -> pad to 80 for sublane alignment)
WIDTH = 32          # (real: 512)
HEADS = 4           # (real: 8)
HEAD_DIM = WIDTH // HEADS
LAYERS = 2          # (real: 12)
PROJ_DIM = 32       # (real: 512) -> feature_size
PADDING_IDX = 0
LN_EPS = 1e-5
NEG_INF = -1e30     # causal-mask fill (softmax rows always have >=1 valid entry)

assert CONTEXT_LEN % 8 == 0, "pad context length to a multiple of 8 sublanes"


# ------------------------------ fused Pallas kernel ---------------------------
def _clip_text_kernel(x_in_ref,
                      ln1_g_ref, ln1_b_ref, wqkv_ref, bqkv_ref, wo_ref, bo_ref,
                      ln2_g_ref, ln2_b_ref, w1_ref, b1_ref, w2_ref, b2_ref,
                      lnf_g_ref, lnf_b_ref, proj_ref,
                      out_ref,
                      x_sc):
    """grid = (batch_tiles, layers).  One residual block per invocation; the
    activation lives in x_sc (VMEM) across the layer axis; the text head runs
    fused on the last layer iteration."""
    layer = pl.program_id(1)
    n_layers = pl.num_programs(1)

    BT, L, D = x_sc.shape
    M = BT * L

    @pl.when(layer == 0)
    def _():
        x_sc[...] = x_in_ref[...]

    def layer_norm(v, g, b):
        mu = jnp.mean(v, axis=-1, keepdims=True)
        var = jnp.mean((v - mu) ** 2, axis=-1, keepdims=True)
        return (v - mu) * jax.lax.rsqrt(var + LN_EPS) * g + b

    def mm(a, w):  # bf16 MXU matmul, f32 accumulate
        return jnp.dot(a.astype(jnp.bfloat16), w.astype(jnp.bfloat16),
                       preferred_element_type=jnp.float32)

    xf = x_sc[...].reshape(M, D)                         # [B_TILE*L, D] f32

    # ---------------- attention branch: x + MHA(LN1(x)) ----------------
    xn = layer_norm(xf, ln1_g_ref[0], ln1_b_ref[0])
    qkv = mm(xn, wqkv_ref[0]) + bqkv_ref[0]              # [M, 3D]

    scale = 1.0 / (HEAD_DIM ** 0.5)
    q = ((qkv[:, 0 * D:1 * D] * scale).reshape(BT, L, D)).astype(jnp.bfloat16)
    k = (qkv[:, 1 * D:2 * D].reshape(BT, L, D)).astype(jnp.bfloat16)
    v = (qkv[:, 2 * D:3 * D].reshape(BT, L, D)).astype(jnp.bfloat16)

    # causal mask generated in-kernel (no mask input DMA)
    row = jax.lax.broadcasted_iota(jnp.int32, (L, L), 0)
    col = jax.lax.broadcasted_iota(jnp.int32, (L, L), 1)
    causal = (col <= row)[None]                          # [1, L, L]

    # batched-over-sequences attention, small static loop over heads; the
    # head outputs are concatenated and hit the out-projection with ONE matmul.
    o_heads = []
    for h in range(HEADS):
        sl = slice(h * HEAD_DIM, (h + 1) * HEAD_DIM)
        s = jnp.einsum('bld,bmd->blm', q[:, :, sl], k[:, :, sl],
                       preferred_element_type=jnp.float32)      # [BT, L, L]
        s = jnp.where(causal, s, NEG_INF)
        s = s - jnp.max(s, axis=-1, keepdims=True)
        p = jnp.exp(s)
        p = p * pl.reciprocal(jnp.sum(p, axis=-1, keepdims=True), approx=True)
        o_heads.append(
            jnp.einsum('blm,bmd->bld', p.astype(jnp.bfloat16), v[:, :, sl],
                       preferred_element_type=jnp.float32))     # [BT, L, Dh]
    o = jnp.concatenate(o_heads, axis=-1).reshape(M, D)          # [M, D]
    xf = xf + mm(o, wo_ref[0]) + bo_ref[0]

    # ---------------- MLP branch: x + fc2(QuickGELU(fc1(LN2(x)))) --------
    xn2 = layer_norm(xf, ln2_g_ref[0], ln2_b_ref[0])
    h1 = mm(xn2, w1_ref[0]) + b1_ref[0]
    h1 = h1 * jax.nn.sigmoid(1.702 * h1)                 # QuickGELU (f32)
    xf = xf + mm(h1, w2_ref[0]) + b2_ref[0]

    x_sc[...] = xf.reshape(BT, L, D)

    # ---------------- fused text head on the last layer ------------------
    @pl.when(layer == n_layers - 1)
    def _():
        # wrapper spec takes token 0:  (ln_final(x) @ text_projection)[:, 0, :]
        x0 = xf.reshape(BT, L, D)[:, 0, :]               # [BT, D]
        xn0 = layer_norm(x0, lnf_g_ref[...], lnf_b_ref[...])
        feat = mm(xn0, proj_ref[...])                    # [BT, P]
        out_ref[...] = feat.reshape(BT, 1, feat.shape[-1])


# ------------------------------ wrapper ----------------------------------------
def clip_text_transformer(x, p, *, b_tile):
    """x: [B, L, D] f32 embeddings -> features [B, PROJ_DIM] f32."""
    B, L, D = x.shape
    P = p['text_projection'].shape[-1]
    n_layers = p['wqkv'].shape[0]
    assert B % b_tile == 0
    grid = (B // b_tile, n_layers)

    xmap = lambda b, l: (b, 0, 0)        # resident across the layer axis
    wmap = lambda b, l: (l, 0, 0)        # streamed over the layer axis
    hmap = lambda b, l: (0, 0)           # head params: constant block

    in_specs = [
        pl.BlockSpec((b_tile, L, D), xmap),                       # x
        pl.BlockSpec((1, 1, D), wmap), pl.BlockSpec((1, 1, D), wmap),      # ln1
        pl.BlockSpec((1, D, 3 * D), wmap), pl.BlockSpec((1, 1, 3 * D), wmap),  # qkv
        pl.BlockSpec((1, D, D), wmap), pl.BlockSpec((1, 1, D), wmap),      # out proj
        pl.BlockSpec((1, 1, D), wmap), pl.BlockSpec((1, 1, D), wmap),      # ln2
        pl.BlockSpec((1, D, 4 * D), wmap), pl.BlockSpec((1, 1, 4 * D), wmap),  # fc1
        pl.BlockSpec((1, 4 * D, D), wmap), pl.BlockSpec((1, 1, D), wmap),  # fc2
        pl.BlockSpec((1, D), hmap), pl.BlockSpec((1, D), hmap),            # ln_final
        pl.BlockSpec((D, P), hmap),                                        # projection
    ]

    out = pl.pallas_call(
        _clip_text_kernel,
        out_shape=jax.ShapeDtypeStruct((B, 1, P), jnp.float32),
        grid=grid,
        in_specs=in_specs,
        out_specs=pl.BlockSpec((b_tile, 1, P), lambda b, l: (b, 0, 0)),
        scratch_shapes=[pltpu.VMEM((b_tile, L, D), jnp.float32)],
        compiler_params=pltpu.CompilerParams(
            dimension_semantics=("parallel", "arbitrary"),
            # at real size (D=512) per-layer bf16 weights are ~6.3 MiB; with
            # double-buffering plus the resident activation this stays well
            # inside 64 MiB even on v7x.
            vmem_limit_bytes=64 * 1024 * 1024,
        ),
    )(x,
      p['ln1_g'], p['ln1_b'], p['wqkv'], p['bqkv'], p['wo'], p['bo'],
      p['ln2_g'], p['ln2_b'], p['w1'], p['b1'], p['w2'], p['b2'],
      p['ln_final_g'], p['ln_final_b'], p['text_projection'])
    return out.reshape(B, P)


def clip_text_encode(token_ids, params, *, b_tile=2):
    """token_ids: [B, L_in] int32  ->  features [B, PROJ_DIM] float32."""
    B, L_in = token_ids.shape
    # F.pad(x, (0, context_length - L), value=padding_idx)
    ids = jnp.pad(token_ids, ((0, 0), (0, CONTEXT_LEN - L_in)),
                  constant_values=PADDING_IDX)
    # embedding gather + positional embedding (glue, not the hot path)
    x = (params['token_embedding'][ids]
         + params['positional_embedding'][None, :, :]).astype(jnp.float32)
    return clip_text_transformer(x, params, b_tile=b_tile)


# ------------------------------ param init / packing ---------------------------
def init_params(key):
    n_keys = 3 + LAYERS * 4
    keys = iter(jax.random.split(key, n_keys))
    D = WIDTH

    tok = 0.02 * jax.random.normal(next(keys), (VOCAB, D), jnp.float32)
    tok = tok.at[PADDING_IDX].set(0.0)  # nn.Embedding(padding_idx=...) zero row
    pos = 0.01 * jax.random.normal(next(keys), (CONTEXT_LEN, D), jnp.float32)

    layers = []
    for _ in range(LAYERS):
        wqkv = 0.05 * jax.random.normal(next(keys), (D, 3 * D), jnp.float32)
        wo = 0.05 * jax.random.normal(next(keys), (D, D), jnp.float32)
        w1 = 0.05 * jax.random.normal(next(keys), (D, 4 * D), jnp.float32)
        w2 = 0.05 * jax.random.normal(next(keys), (4 * D, D), jnp.float32)
        layers.append(dict(
            ln1_g=jnp.ones((1, D), jnp.float32), ln1_b=jnp.zeros((1, D), jnp.float32),
            wqkv=wqkv, bqkv=jnp.zeros((1, 3 * D), jnp.float32),
            wo=wo, bo=jnp.zeros((1, D), jnp.float32),
            ln2_g=jnp.ones((1, D), jnp.float32), ln2_b=jnp.zeros((1, D), jnp.float32),
            w1=w1, b1=jnp.zeros((1, 4 * D), jnp.float32),
            w2=w2, b2=jnp.zeros((1, D), jnp.float32),
        ))

    proj = 0.05 * jax.random.normal(next(keys), (D, PROJ_DIM), jnp.float32)
    return dict(token_embedding=tok, positional_embedding=pos, layers=layers,
                ln_final_g=jnp.ones((1, D), jnp.float32),
                ln_final_b=jnp.zeros((1, D), jnp.float32),
                text_projection=proj)


def pack_params(params):
    """Stack per-layer weights as [LAYERS, ...]; matmul weights -> bf16 for the MXU."""
    def stack(name, dtype=jnp.float32):
        return jnp.stack([lp[name] for lp in params['layers']]).astype(dtype)

    return dict(
        token_embedding=params['token_embedding'],
        positional_embedding=params['positional_embedding'],
        ln1_g=stack('ln1_g'), ln1_b=stack('ln1_b'),
        wqkv=stack('wqkv', jnp.bfloat16), bqkv=stack('bqkv'),
        wo=stack('wo', jnp.bfloat16), bo=stack('bo'),
        ln2_g=stack('ln2_g'), ln2_b=stack('ln2_b'),
        w1=stack('w1', jnp.bfloat16), b1=stack('b1'),
        w2=stack('w2', jnp.bfloat16), b2=stack('b2'),
        ln_final_g=params['ln_final_g'], ln_final_b=params['ln_final_b'],
        text_projection=params['text_projection'].astype(jnp.bfloat16),
    )


# ------------------------------ main -------------------------------------------
if __name__ == "__main__":
    key = jax.random.PRNGKey(0)
    k_params, k_tok = jax.random.split(key)
    params = pack_params(init_params(k_params))

    B, L_in = 4, 8            # B_TILE=2 -> parallel grid extent 2 (v7x megacore)
    tokens = jax.random.randint(k_tok, (B, L_in), 1, VOCAB, dtype=jnp.int32)

    encode = jax.jit(functools.partial(clip_text_encode, params=params, b_tile=2))
    feats = jax.block_until_ready(encode(tokens))

    assert feats.shape == (B, PROJ_DIM), feats.shape
    assert jnp.all(jnp.isfinite(feats))
    print("KERNEL_OK")
</pallas_src>

<mosaic_0001>
module attributes {stable_mosaic.version = 11 : i64} {
  func.func @_clip_text_kernel(%arg0: i32, %arg1: i32, %arg2: memref<2x16x32xf32, #tpu.memory_space<vmem>>, %arg3: memref<1x1x32xf32, #tpu.memory_space<vmem>>, %arg4: memref<1x1x32xf32, #tpu.memory_space<vmem>>, %arg5: memref<1x32x96xbf16, #tpu.memory_space<vmem>>, %arg6: memref<1x1x96xf32, #tpu.memory_space<vmem>>, %arg7: memref<1x32x32xbf16, #tpu.memory_space<vmem>>, %arg8: memref<1x1x32xf32, #tpu.memory_space<vmem>>, %arg9: memref<1x1x32xf32, #tpu.memory_space<vmem>>, %arg10: memref<1x1x32xf32, #tpu.memory_space<vmem>>, %arg11: memref<1x32x128xbf16, #tpu.memory_space<vmem>>, %arg12: memref<1x1x128xf32, #tpu.memory_space<vmem>>, %arg13: memref<1x128x32xbf16, #tpu.memory_space<vmem>>, %arg14: memref<1x1x32xf32, #tpu.memory_space<vmem>>, %arg15: memref<1x32xf32, #tpu.memory_space<vmem>>, %arg16: memref<1x32xf32, #tpu.memory_space<vmem>>, %arg17: memref<32x32xbf16, #tpu.memory_space<vmem>>, %arg18: memref<2x1x32xf32, #tpu.memory_space<vmem>>, %arg19: memref<2x16x32xf32, #tpu.memory_space<vmem>>) attributes {dimension_semantics = [#tpu.dimension_semantics<parallel>, #tpu.dimension_semantics<arbitrary>], iteration_bounds = array<i64: 2, 2>, scalar_prefetch = 0 : i64, scratch_operands = 1 : i64, tpu.core_type = #tpu.core_type<tc>, window_params = [{transform_indices = @transform_0, window_bounds = array<i64: 2, 16, 32>}, {transform_indices = @transform_1, window_bounds = array<i64: 1, 1, 32>}, {transform_indices = @transform_2, window_bounds = array<i64: 1, 1, 32>}, {transform_indices = @transform_3, window_bounds = array<i64: 1, 32, 96>}, {transform_indices = @transform_4, window_bounds = array<i64: 1, 1, 96>}, {transform_indices = @transform_5, window_bounds = array<i64: 1, 32, 32>}, {transform_indices = @transform_6, window_bounds = array<i64: 1, 1, 32>}, {transform_indices = @transform_7, window_bounds = array<i64: 1, 1, 32>}, {transform_indices = @transform_8, window_bounds = array<i64: 1, 1, 32>}, {transform_indices = @transform_9, window_bounds = array<i64: 1, 32, 128>}, {transform_indices = @transform_10, window_bounds = array<i64: 1, 1, 128>}, {transform_indices = @transform_11, window_bounds = array<i64: 1, 128, 32>}, {transform_indices = @transform_12, window_bounds = array<i64: 1, 1, 32>}, {pipeline_mode = #tpu.pipeline_mode<synchronous>, transform_indices = @transform_13, window_bounds = array<i64: 1, 32>}, {pipeline_mode = #tpu.pipeline_mode<synchronous>, transform_indices = @transform_14, window_bounds = array<i64: 1, 32>}, {pipeline_mode = #tpu.pipeline_mode<synchronous>, transform_indices = @transform_15, window_bounds = array<i64: 32, 32>}, {transform_indices = @transform_16, window_bounds = array<i64: 2, 1, 32>}]} {
    %c0_i32 = arith.constant 0 : i32
    %0 = arith.cmpi eq, %arg1, %c0_i32 : i32
    %1 = arith.extui %0 : i1 to i32
    %c0_i32_0 = arith.constant 0 : i32
    %2 = arith.cmpi ne, %1, %c0_i32_0 : i32
    scf.if %2 {
      %c0_79 = arith.constant 0 : index
      %c0_80 = arith.constant 0 : index
      %c0_81 = arith.constant 0 : index
      %201 = vector.load %arg2[%c0_79, %c0_80, %c0_81] : memref<2x16x32xf32, #tpu.memory_space<vmem>>, vector<2x16x32xf32>
      %c0_82 = arith.constant 0 : index
      %c0_83 = arith.constant 0 : index
      %c0_84 = arith.constant 0 : index
      %202 = vector.load %arg19[%c0_82, %c0_83, %c0_84] : memref<2x16x32xf32, #tpu.memory_space<vmem>>, vector<2x16x32xf32>
      tpu.vector_store %arg19[%c0_82, %c0_83, %c0_84], %201 {strides = array<i32>} : memref<2x16x32xf32, #tpu.memory_space<vmem>>, vector<2x16x32xf32>,
    } else {
    }
    %c0 = arith.constant 0 : index
    %c0_1 = arith.constant 0 : index
    %c0_2 = arith.constant 0 : index
    %3 = vector.load %arg19[%c0, %c0_1, %c0_2] : memref<2x16x32xf32, #tpu.memory_space<vmem>>, vector<2x16x32xf32>
    %4 = vector.shape_cast %3 : vector<2x16x32xf32> to vector<32x32xf32>
    %c0_3 = arith.constant 0 : index
    %c0_4 = arith.constant 0 : index
    %c0_5 = arith.constant 0 : index
    %5 = vector.load %arg3[%c0_3, %c0_4, %c0_5] : memref<1x1x32xf32, #tpu.memory_space<vmem>>, vector<1x1x32xf32>
    %6 = vector.shape_cast %5 : vector<1x1x32xf32> to vector<1x32xf32>
    %c0_6 = arith.constant 0 : index
    %c0_7 = arith.constant 0 : index
    %c0_8 = arith.constant 0 : index
    %7 = vector.load %arg4[%c0_6, %c0_7, %c0_8] : memref<1x1x32xf32, #tpu.memory_space<vmem>>, vector<1x1x32xf32>
    %8 = vector.shape_cast %7 : vector<1x1x32xf32> to vector<1x32xf32>
    %cst = arith.constant dense<0.000000e+00> : vector<32xf32>
    %9 = vector.multi_reduction <add>, %4, %cst [1] : vector<32x32xf32> to vector<32xf32>
    %10 = vector.shape_cast %9 : vector<32xf32> to vector<32x1xf32>
    %cst_9 = arith.constant 3.200000e+01 : f32
    %11 = vector.broadcast %cst_9 : f32 to vector<32x1xf32>
    %12 = arith.divf %10, %11 : vector<32x1xf32>
    %13 = vector.broadcast %12 : vector<32x1xf32> to vector<32x32xf32>
    %14 = arith.subf %4, %13 : vector<32x32xf32>
    %15 = arith.mulf %14, %14 : vector<32x32xf32>
    %cst_10 = arith.constant dense<0.000000e+00> : vector<32xf32>
    %16 = vector.multi_reduction <add>, %15, %cst_10 [1] : vector<32x32xf32> to vector<32xf32>
    %17 = vector.shape_cast %16 : vector<32xf32> to vector<32x1xf32>
    %cst_11 = arith.constant 3.200000e+01 : f32
    %18 = vector.broadcast %cst_11 : f32 to vector<32x1xf32>
    %19 = arith.divf %17, %18 : vector<32x1xf32>
    %20 = vector.broadcast %12 : vector<32x1xf32> to vector<32x32xf32>
    %21 = arith.subf %4, %20 : vector<32x32xf32>
    %cst_12 = arith.constant 9.99999974E-6 : f32
    %22 = vector.broadcast %cst_12 : f32 to vector<32x1xf32>
    %23 = arith.addf %19, %22 : vector<32x1xf32>
    %24 = math.rsqrt %23 : vector<32x1xf32>
    %25 = vector.broadcast %24 : vector<32x1xf32> to vector<32x32xf32>
    %26 = arith.mulf %21, %25 : vector<32x32xf32>
    %27 = vector.broadcast %6 : vector<1x32xf32> to vector<32x32xf32>
    %28 = arith.mulf %26, %27 : vector<32x32xf32>
    %29 = vector.broadcast %8 : vector<1x32xf32> to vector<32x32xf32>
    %30 = arith.addf %28, %29 : vector<32x32xf32>
    %c0_13 = arith.constant 0 : index
    %c0_14 = arith.constant 0 : index
    %c0_15 = arith.constant 0 : index
    %31 = vector.load %arg5[%c0_13, %c0_14, %c0_15] : memref<1x32x96xbf16, #tpu.memory_space<vmem>>, vector<1x32x96xbf16>
    %32 = vector.shape_cast %31 : vector<1x32x96xbf16> to vector<32x96xbf16>
    %33 = arith.truncf %30 : vector<32x32xf32> to vector<32x32xbf16>
    %cst_16 = arith.constant dense<0.000000e+00> : vector<32x96xf32>
    %34 = tpu.matmul %33, %32, %cst_16 {dimension_numbers = #tpu.dot_dimension_numbers<[1], [0], [0], [1], [0, 0, 1, 1], [], []>} : vector<32x32xbf16>, vector<32x96xbf16>, vector<32x96xf32> -> vector<32x96xf32>
    %c0_17 = arith.constant 0 : index
    %c0_18 = arith.constant 0 : index
    %c0_19 = arith.constant 0 : index
    %35 = vector.load %arg6[%c0_17, %c0_18, %c0_19] : memref<1x1x96xf32, #tpu.memory_space<vmem>>, vector<1x1x96xf32>
    %36 = vector.shape_cast %35 : vector<1x1x96xf32> to vector<1x96xf32>
    %37 = vector.broadcast %36 : vector<1x96xf32> to vector<32x96xf32>
    %38 = arith.addf %34, %37 : vector<32x96xf32>
    %39 = vector.extract_strided_slice %38 {offsets = [0, 0], sizes = [32, 32], strides = [1, 1]} : vector<32x96xf32> to vector<32x32xf32>
    %cst_20 = arith.constant 0.353553385 : f32
    %40 = vector.broadcast %cst_20 : f32 to vector<32x32xf32>
    %41 = arith.mulf %39, %40 : vector<32x32xf32>
    %42 = vector.shape_cast %41 : vector<32x32xf32> to vector<2x16x32xf32>
    %43 = arith.truncf %42 : vector<2x16x32xf32> to vector<2x16x32xbf16>
    %44 = vector.extract_strided_slice %38 {offsets = [0, 32], sizes = [32, 32], strides = [1, 1]} : vector<32x96xf32> to vector<32x32xf32>
    %45 = vector.shape_cast %44 : vector<32x32xf32> to vector<2x16x32xf32>
    %46 = arith.truncf %45 : vector<2x16x32xf32> to vector<2x16x32xbf16>
    %47 = vector.extract_strided_slice %38 {offsets = [0, 64], sizes = [32, 32], strides = [1, 1]} : vector<32x96xf32> to vector<32x32xf32>
    %48 = vector.shape_cast %47 : vector<32x32xf32> to vector<2x16x32xf32>
    %49 = arith.truncf %48 : vector<2x16x32xf32> to vector<2x16x32xbf16>
    %50 = tpu.iota {dimensions = array<i32: 0>} : vector<16x16xi32>
    %51 = tpu.iota {dimensions = array<i32: 1>} : vector<16x16xi32>
    %52 = arith.cmpi sle, %51, %50 : vector<16x16xi32>
    %53 = vector.shape_cast %52 : vector<16x16xi1> to vector<1x16x16xi1>
    %54 = vector.extract_strided_slice %43 {offsets = [0, 0, 0], sizes = [2, 16, 8], strides = [1, 1, 1]} : vector<2x16x32xbf16> to vector<2x16x8xbf16>
    %55 = vector.extract_strided_slice %46 {offsets = [0, 0, 0], sizes = [2, 16, 8], strides = [1, 1, 1]} : vector<2x16x32xbf16> to vector<2x16x8xbf16>
    "tpu.trace_start"() <{level = 10 : i32, message = "bld,bmd->blm"}> : () -> ()
    %cst_21 = arith.constant dense<0.000000e+00> : vector<2x16x16xf32>
    %56 = tpu.matmul %54, %55, %cst_21 {dimension_numbers = #tpu.dot_dimension_numbers<[2], [2], [1], [1], [0, 0, 0, 1, 1, 1], [0], [0]>} : vector<2x16x8xbf16>, vector<2x16x8xbf16>, vector<2x16x16xf32> -> vector<2x16x16xf32>
    %cst_22 = arith.constant -1.000000e+30 : f32
    "tpu.trace_stop"() : () -> ()
    %57 = vector.shape_cast %53 : vector<1x16x16xi1> to vector<1x16x16xi1>
    %58 = vector.broadcast %57 : vector<1x16x16xi1> to vector<2x16x16xi1>
    %59 = vector.broadcast %cst_22 : f32 to vector<2x16x16xf32>
    %60 = arith.select %58, %56, %59 : vector<2x16x16xi1>, vector<2x16x16xf32>
    %cst_23 = arith.constant dense<0xFF800000> : vector<2x16xf32>
    %61 = vector.multi_reduction <maximumf>, %60, %cst_23 [2] : vector<2x16x16xf32> to vector<2x16xf32>
    %62 = vector.shape_cast %61 : vector<2x16xf32> to vector<2x16x1xf32>
    %63 = vector.broadcast %62 : vector<2x16x1xf32> to vector<2x16x16xf32>
    %64 = arith.subf %60, %63 : vector<2x16x16xf32>
    %65 = math.exp %64 : vector<2x16x16xf32>
    %cst_24 = arith.constant dense<0.000000e+00> : vector<2x16xf32>
    %66 = vector.multi_reduction <add>, %65, %cst_24 [2] : vector<2x16x16xf32> to vector<2x16xf32>
    %67 = vector.shape_cast %66 : vector<2x16xf32> to vector<2x16x1xf32>
    %68 = tpu.reciprocal %67 {approx = true} : vector<2x16x1xf32> -> vector<2x16x1xf32>
    %69 = vector.broadcast %68 : vector<2x16x1xf32> to vector<2x16x16xf32>
    %70 = arith.mulf %65, %69 : vector<2x16x16xf32>
    %71 = arith.truncf %70 : vector<2x16x16xf32> to vector<2x16x16xbf16>
    %72 = vector.extract_strided_slice %49 {offsets = [0, 0, 0], sizes = [2, 16, 8], strides = [1, 1, 1]} : vector<2x16x32xbf16> to vector<2x16x8xbf16>
    "tpu.trace_start"() <{level = 10 : i32, message = "blm,bmd->bld"}> : () -> ()
    %cst_25 = arith.constant dense<0.000000e+00> : vector<2x16x8xf32>
    %73 = tpu.matmul %71, %72, %cst_25 {dimension_numbers = #tpu.dot_dimension_numbers<[2], [1], [1], [2], [0, 0, 0, 1, 1, 2], [0], [0]>} : vector<2x16x16xbf16>, vector<2x16x8xbf16>, vector<2x16x8xf32> -> vector<2x16x8xf32>
    "tpu.trace_stop"() : () -> ()
    %74 = vector.extract_strided_slice %43 {offsets = [0, 0, 8], sizes = [2, 16, 8], strides = [1, 1, 1]} : vector<2x16x32xbf16> to vector<2x16x8xbf16>
    %75 = vector.extract_strided_slice %46 {offsets = [0, 0, 8], sizes = [2, 16, 8], strides = [1, 1, 1]} : vector<2x16x32xbf16> to vector<2x16x8xbf16>
    "tpu.trace_start"() <{level = 10 : i32, message = "bld,bmd->blm"}> : () -> ()
    %cst_26 = arith.constant dense<0.000000e+00> : vector<2x16x16xf32>
    %76 = tpu.matmul %74, %75, %cst_26 {dimension_numbers = #tpu.dot_dimension_numbers<[2], [2], [1], [1], [0, 0, 0, 1, 1, 1], [0], [0]>} : vector<2x16x8xbf16>, vector<2x16x8xbf16>, vector<2x16x16xf32> -> vector<2x16x16xf32>
    %cst_27 = arith.constant -1.000000e+30 : f32
    "tpu.trace_stop"() : () -> ()
    %77 = vector.shape_cast %53 : vector<1x16x16xi1> to vector<1x16x16xi1>
    %78 = vector.broadcast %77 : vector<1x16x16xi1> to vector<2x16x16xi1>
    %79 = vector.broadcast %cst_27 : f32 to vector<2x16x16xf32>
    %80 = arith.select %78, %76, %79 : vector<2x16x16xi1>, vector<2x16x16xf32>
    %cst_28 = arith.constant dense<0xFF800000> : vector<2x16xf32>
    %81 = vector.multi_reduction <maximumf>, %80, %cst_28 [2] : vector<2x16x16xf32> to vector<2x16xf32>
    %82 = vector.shape_cast %81 : vector<2x16xf32> to vector<2x16x1xf32>
    %83 = vector.broadcast %82 : vector<2x16x1xf32> to vector<2x16x16xf32>
    %84 = arith.subf %80, %83 : vector<2x16x16xf32>
    %85 = math.exp %84 : vector<2x16x16xf32>
    %cst_29 = arith.constant dense<0.000000e+00> : vector<2x16xf32>
    %86 = vector.multi_reduction <add>, %85, %cst_29 [2] : vector<2x16x16xf32> to vector<2x16xf32>
    %87 = vector.shape_cast %86 : vector<2x16xf32> to vector<2x16x1xf32>
    %88 = tpu.reciprocal %87 {approx = true} : vector<2x16x1xf32> -> vector<2x16x1xf32>
    %89 = vector.broadcast %88 : vector<2x16x1xf32> to vector<2x16x16xf32>
    %90 = arith.mulf %85, %89 : vector<2x16x16xf32>
    %91 = arith.truncf %90 : vector<2x16x16xf32> to vector<2x16x16xbf16>
    %92 = vector.extract_strided_slice %49 {offsets = [0, 0, 8], sizes = [2, 16, 8], strides = [1, 1, 1]} : vector<2x16x32xbf16> to vector<2x16x8xbf16>
    "tpu.trace_start"() <{level = 10 : i32, message = "blm,bmd->bld"}> : () -> ()
    %cst_30 = arith.constant dense<0.000000e+00> : vector<2x16x8xf32>
    %93 = tpu.matmul %91, %92, %cst_30 {dimension_numbers = #tpu.dot_dimension_numbers<[2], [1], [1], [2], [0, 0, 0, 1, 1, 2], [0], [0]>} : vector<2x16x16xbf16>, vector<2x16x8xbf16>, vector<2x16x8xf32> -> vector<2x16x8xf32>
    "tpu.trace_stop"() : () -> ()
    %94 = vector.extract_strided_slice %43 {offsets = [0, 0, 16], sizes = [2, 16, 8], strides = [1, 1, 1]} : vector<2x16x32xbf16> to vector<2x16x8xbf16>
    %95 = vector.extract_strided_slice %46 {offsets = [0, 0, 16], sizes = [2, 16, 8], strides = [1, 1, 1]} : vector<2x16x32xbf16> to vector<2x16x8xbf16>
    "tpu.trace_start"() <{level = 10 : i32, message = "bld,bmd->blm"}> : () -> ()
    %cst_31 = arith.constant dense<0.000000e+00> : vector<2x16x16xf32>
    %96 = tpu.matmul %94, %95, %cst_31 {dimension_numbers = #tpu.dot_dimension_numbers<[2], [2], [1], [1], [0, 0, 0, 1, 1, 1], [0], [0]>} : vector<2x16x8xbf16>, vector<2x16x8xbf16>, vector<2x16x16xf32> -> vector<2x16x16xf32>
    %cst_32 = arith.constant -1.000000e+30 : f32
    "tpu.trace_stop"() : () -> ()
    %97 = vector.shape_cast %53 : vector<1x16x16xi1> to vector<1x16x16xi1>
    %98 = vector.broadcast %97 : vector<1x16x16xi1> to vector<2x16x16xi1>
    %99 = vector.broadcast %cst_32 : f32 to vector<2x16x16xf32>
    %100 = arith.select %98, %96, %99 : vector<2x16x16xi1>, vector<2x16x16xf32>
    %cst_33 = arith.constant dense<0xFF800000> : vector<2x16xf32>
    %101 = vector.multi_reduction <maximumf>, %100, %cst_33 [2] : vector<2x16x16xf32> to vector<2x16xf32>
    %102 = vector.shape_cast %101 : vector<2x16xf32> to vector<2x16x1xf32>
    %103 = vector.broadcast %102 : vector<2x16x1xf32> to vector<2x16x16xf32>
    %104 = arith.subf %100, %103 : vector<2x16x16xf32>
    %105 = math.exp %104 : vector<2x16x16xf32>
    %cst_34 = arith.constant dense<0.000000e+00> : vector<2x16xf32>
    %106 = vector.multi_reduction <add>, %105, %cst_34 [2] : vector<2x16x16xf32> to vector<2x16xf32>
    %107 = vector.shape_cast %106 : vector<2x16xf32> to vector<2x16x1xf32>
    %108 = tpu.reciprocal %107 {approx = true} : vector<2x16x1xf32> -> vector<2x16x1xf32>
    %109 = vector.broadcast %108 : vector<2x16x1xf32> to vector<2x16x16xf32>
    %110 = arith.mulf %105, %109 : vector<2x16x16xf32>
    %111 = arith.truncf %110 : vector<2x16x16xf32> to vector<2x16x16xbf16>
    %112 = vector.extract_strided_slice %49 {offsets = [0, 0, 16], sizes = [2, 16, 8], strides = [1, 1, 1]} : vector<2x16x32xbf16> to vector<2x16x8xbf16>
    "tpu.trace_start"() <{level = 10 : i32, message = "blm,bmd->bld"}> : () -> ()
    %cst_35 = arith.constant dense<0.000000e+00> : vector<2x16x8xf32>
    %113 = tpu.matmul %111, %112, %cst_35 {dimension_numbers = #tpu.dot_dimension_numbers<[2], [1], [1], [2], [0, 0, 0, 1, 1, 2], [0], [0]>} : vector<2x16x16xbf16>, vector<2x16x8xbf16>, vector<2x16x8xf32> -> vector<2x16x8xf32>
    "tpu.trace_stop"() : () -> ()
    %114 = vector.extract_strided_slice %43 {offsets = [0, 0, 24], sizes = [2, 16, 8], strides = [1, 1, 1]} : vector<2x16x32xbf16> to vector<2x16x8xbf16>
    %115 = vector.extract_strided_slice %46 {offsets = [0, 0, 24], sizes = [2, 16, 8], strides = [1, 1, 1]} : vector<2x16x32xbf16> to vector<2x16x8xbf16>
    "tpu.trace_start"() <{level = 10 : i32, message = "bld,bmd->blm"}> : () -> ()
    %cst_36 = arith.constant dense<0.000000e+00> : vector<2x16x16xf32>
    %116 = tpu.matmul %114, %115, %cst_36 {dimension_numbers = #tpu.dot_dimension_numbers<[2], [2], [1], [1], [0, 0, 0, 1, 1, 1], [0], [0]>} : vector<2x16x8xbf16>, vector<2x16x8xbf16>, vector<2x16x16xf32> -> vector<2x16x16xf32>
    %cst_37 = arith.constant -1.000000e+30 : f32
    "tpu.trace_stop"() : () -> ()
    %117 = vector.shape_cast %53 : vector<1x16x16xi1> to vector<1x16x16xi1>
    %118 = vector.broadcast %117 : vector<1x16x16xi1> to vector<2x16x16xi1>
    %119 = vector.broadcast %cst_37 : f32 to vector<2x16x16xf32>
    %120 = arith.select %118, %116, %119 : vector<2x16x16xi1>, vector<2x16x16xf32>
    %cst_38 = arith.constant dense<0xFF800000> : vector<2x16xf32>
    %121 = vector.multi_reduction <maximumf>, %120, %cst_38 [2] : vector<2x16x16xf32> to vector<2x16xf32>
    %122 = vector.shape_cast %121 : vector<2x16xf32> to vector<2x16x1xf32>
    %123 = vector.broadcast %122 : vector<2x16x1xf32> to vector<2x16x16xf32>
    %124 = arith.subf %120, %123 : vector<2x16x16xf32>
    %125 = math.exp %124 : vector<2x16x16xf32>
    %cst_39 = arith.constant dense<0.000000e+00> : vector<2x16xf32>
    %126 = vector.multi_reduction <add>, %125, %cst_39 [2] : vector<2x16x16xf32> to vector<2x16xf32>
    %127 = vector.shape_cast %126 : vector<2x16xf32> to vector<2x16x1xf32>
    %128 = tpu.reciprocal %127 {approx = true} : vector<2x16x1xf32> -> vector<2x16x1xf32>
    %129 = vector.broadcast %128 : vector<2x16x1xf32> to vector<2x16x16xf32>
    %130 = arith.mulf %125, %129 : vector<2x16x16xf32>
    %131 = arith.truncf %130 : vector<2x16x16xf32> to vector<2x16x16xbf16>
    %132 = vector.extract_strided_slice %49 {offsets = [0, 0, 24], sizes = [2, 16, 8], strides = [1, 1, 1]} : vector<2x16x32xbf16> to vector<2x16x8xbf16>
    "tpu.trace_start"() <{level = 10 : i32, message = "blm,bmd->bld"}> : () -> ()
    %cst_40 = arith.constant dense<0.000000e+00> : vector<2x16x8xf32>
    %133 = tpu.matmul %131, %132, %cst_40 {dimension_numbers = #tpu.dot_dimension_numbers<[2], [1], [1], [2], [0, 0, 0, 1, 1, 2], [0], [0]>} : vector<2x16x16xbf16>, vector<2x16x8xbf16>, vector<2x16x8xf32> -> vector<2x16x8xf32>
    "tpu.trace_stop"() : () -> ()
    %134 = tpu.concatenate %73, %93, %113, %133 in 2 : vector<2x16x8xf32>, vector<2x16x8xf32>, vector<2x16x8xf32>, vector<2x16x8xf32> -> vector<2x16x32xf32>
    %135 = vector.shape_cast %134 : vector<2x16x32xf32> to vector<32x32xf32>
    %c0_41 = arith.constant 0 : index
    %c0_42 = arith.constant 0 : index
    %c0_43 = arith.constant 0 : index
    %136 = vector.load %arg7[%c0_41, %c0_42, %c0_43] : memref<1x32x32xbf16, #tpu.memory_space<vmem>>, vector<1x32x32xbf16>
    %137 = vector.shape_cast %136 : vector<1x32x32xbf16> to vector<32x32xbf16>
    %138 = arith.truncf %135 : vector<32x32xf32> to vector<32x32xbf16>
    %cst_44 = arith.constant dense<0.000000e+00> : vector<32x32xf32>
    %139 = tpu.matmul %138, %137, %cst_44 {dimension_numbers = #tpu.dot_dimension_numbers<[1], [0], [0], [1], [0, 0, 1, 1], [], []>} : vector<32x32xbf16>, vector<32x32xbf16>, vector<32x32xf32> -> vector<32x32xf32>
    %140 = arith.addf %4, %139 : vector<32x32xf32>
    %c0_45 = arith.constant 0 : index
    %c0_46 = arith.constant 0 : index
    %c0_47 = arith.constant 0 : index
    %141 = vector.load %arg8[%c0_45, %c0_46, %c0_47] : memref<1x1x32xf32, #tpu.memory_space<vmem>>, vector<1x1x32xf32>
    %142 = vector.shape_cast %141 : vector<1x1x32xf32> to vector<1x32xf32>
    %143 = vector.broadcast %142 : vector<1x32xf32> to vector<32x32xf32>
    %144 = arith.addf %140, %143 : vector<32x32xf32>
    %c0_48 = arith.constant 0 : index
    %c0_49 = arith.constant 0 : index
    %c0_50 = arith.constant 0 : index
    %145 = vector.load %arg9[%c0_48, %c0_49, %c0_50] : memref<1x1x32xf32, #tpu.memory_space<vmem>>, vector<1x1x32xf32>
    %146 = vector.shape_cast %145 : vector<1x1x32xf32> to vector<1x32xf32>
    %c0_51 = arith.constant 0 : index
    %c0_52 = arith.constant 0 : index
    %c0_53 = arith.constant 0 : index
    %147 = vector.load %arg10[%c0_51, %c0_52, %c0_53] : memref<1x1x32xf32, #tpu.memory_space<vmem>>, vector<1x1x32xf32>
    %148 = vector.shape_cast %147 : vector<1x1x32xf32> to vector<1x32xf32>
    %cst_54 = arith.constant dense<0.000000e+00> : vector<32xf32>
    %149 = vector.multi_reduction <add>, %144, %cst_54 [1] : vector<32x32xf32> to vector<32xf32>
    %150 = vector.shape_cast %149 : vector<32xf32> to vector<32x1xf32>
    %cst_55 = arith.constant 3.200000e+01 : f32
    %151 = vector.broadcast %cst_55 : f32 to vector<32x1xf32>
    %152 = arith.divf %150, %151 : vector<32x1xf32>
    %153 = vector.broadcast %152 : vector<32x1xf32> to vector<32x32xf32>
    %154 = arith.subf %144, %153 : vector<32x32xf32>
    %155 = arith.mulf %154, %154 : vector<32x32xf32>
    %cst_56 = arith.constant dense<0.000000e+00> : vector<32xf32>
    %156 = vector.multi_reduction <add>, %155, %cst_56 [1] : vector<32x32xf32> to vector<32xf32>
    %157 = vector.shape_cast %156 : vector<32xf32> to vector<32x1xf32>
    %cst_57 = arith.constant 3.200000e+01 : f32
    %158 = vector.broadcast %cst_57 : f32 to vector<32x1xf32>
    %159 = arith.divf %157, %158 : vector<32x1xf32>
    %160 = vector.broadcast %152 : vector<32x1xf32> to vector<32x32xf32>
    %161 = arith.subf %144, %160 : vector<32x32xf32>
    %cst_58 = arith.constant 9.99999974E-6 : f32
    %162 = vector.broadcast %cst_58 : f32 to vector<32x1xf32>
    %163 = arith.addf %159, %162 : vector<32x1xf32>
    %164 = math.rsqrt %163 : vector<32x1xf32>
    %165 = vector.broadcast %164 : vector<32x1xf32> to vector<32x32xf32>
    %166 = arith.mulf %161, %165 : vector<32x32xf32>
    %167 = vector.broadcast %146 : vector<1x32xf32> to vector<32x32xf32>
    %168 = arith.mulf %166, %167 : vector<32x32xf32>
    %169 = vector.broadcast %148 : vector<1x32xf32> to vector<32x32xf32>
    %170 = arith.addf %168, %169 : vector<32x32xf32>
    %c0_59 = arith.constant 0 : index
    %c0_60 = arith.constant 0 : index
    %c0_61 = arith.constant 0 : index
    %171 = vector.load %arg11[%c0_59, %c0_60, %c0_61] : memref<1x32x128xbf16, #tpu.memory_space<vmem>>, vector<1x32x128xbf16>
    %172 = vector.shape_cast %171 : vector<1x32x128xbf16> to vector<32x128xbf16>
    %173 = arith.truncf %170 : vector<32x32xf32> to vector<32x32xbf16>
    %cst_62 = arith.constant dense<0.000000e+00> : vector<32x128xf32>
    %174 = tpu.matmul %173, %172, %cst_62 {dimension_numbers = #tpu.dot_dimension_numbers<[1], [0], [0], [1], [0, 0, 1, 1], [], []>} : vector<32x32xbf16>, vector<32x128xbf16>, vector<32x128xf32> -> vector<32x128xf32>
    %c0_63 = arith.constant 0 : index
    %c0_64 = arith.constant 0 : index
    %c0_65 = arith.constant 0 : index
    %175 = vector.load %arg12[%c0_63, %c0_64, %c0_65] : memref<1x1x128xf32, #tpu.memory_space<vmem>>, vector<1x1x128xf32>
    %176 = vector.shape_cast %175 : vector<1x1x128xf32> to vector<1x128xf32>
    %177 = vector.broadcast %176 : vector<1x128xf32> to vector<32x128xf32>
    %178 = arith.addf %174, %177 : vector<32x128xf32>
    %cst_66 = arith.constant 1.702000e+00 : f32
    %179 = vector.broadcast %cst_66 : f32 to vector<32x128xf32>
    %180 = arith.mulf %179, %178 : vector<32x128xf32>
    %181 = arith.negf %180 : vector<32x128xf32>
    %182 = math.exp %181 : vector<32x128xf32>
    %cst_67 = arith.constant 1.000000e+00 : f32
    %183 = vector.broadcast %cst_67 : f32 to vector<32x128xf32>
    %184 = arith.addf %183, %182 : vector<32x128xf32>
    %185 = arith.divf %183, %184 : vector<32x128xf32>
    %186 = arith.mulf %178, %185 : vector<32x128xf32>
    %c0_68 = arith.constant 0 : index
    %c0_69 = arith.constant 0 : index
    %c0_70 = arith.constant 0 : index
    %187 = vector.load %arg13[%c0_68, %c0_69, %c0_70] : memref<1x128x32xbf16, #tpu.memory_space<vmem>>, vector<1x128x32xbf16>
    %188 = vector.shape_cast %187 : vector<1x128x32xbf16> to vector<128x32xbf16>
    %189 = arith.truncf %186 : vector<32x128xf32> to vector<32x128xbf16>
    %cst_71 = arith.constant dense<0.000000e+00> : vector<32x32xf32>
    %190 = tpu.matmul %189, %188, %cst_71 {dimension_numbers = #tpu.dot_dimension_numbers<[1], [0], [0], [1], [0, 0, 1, 1], [], []>} : vector<32x128xbf16>, vector<128x32xbf16>, vector<32x32xf32> -> vector<32x32xf32>
    %191 = arith.addf %144, %190 : vector<32x32xf32>
    %c0_72 = arith.constant 0 : index
    %c0_73 = arith.constant 0 : index
    %c0_74 = arith.constant 0 : index
    %192 = vector.load %arg14[%c0_72, %c0_73, %c0_74] : memref<1x1x32xf32, #tpu.memory_space<vmem>>, vector<1x1x32xf32>
    %193 = vector.shape_cast %192 : vector<1x1x32xf32> to vector<1x32xf32>
    %194 = vector.broadcast %193 : vector<1x32xf32> to vector<32x32xf32>
    %195 = arith.addf %191, %194 : vector<32x32xf32>
    %196 = vector.shape_cast %195 : vector<32x32xf32> to vector<2x16x32xf32>
    %c0_75 = arith.constant 0 : index
    %c0_76 = arith.constant 0 : index
    %c0_77 = arith.constant 0 : index
    %197 = vector.load %arg19[%c0_75, %c0_76, %c0_77] : memref<2x16x32xf32, #tpu.memory_space<vmem>>, vector<2x16x32xf32>
    tpu.vector_store %arg19[%c0_75, %c0_76, %c0_77], %196 {strides = array<i32>} : memref<2x16x32xf32, #tpu.memory_space<vmem>>, vector<2x16x32xf32>,
    %c1_i32 = arith.constant 1 : i32
    %198 = arith.cmpi eq, %arg1, %c1_i32 : i32
    %199 = arith.extui %198 : i1 to i32
    %c0_i32_78 = arith.constant 0 : i32
    %200 = arith.cmpi ne, %199, %c0_i32_78 : i32
    scf.if %200 {
      %201 = vector.shape_cast %195 : vector<32x32xf32> to vector<2x16x32xf32>
      %202 = vector.extract_strided_slice %201 {offsets = [0, 0, 0], sizes = [2, 1, 32], strides = [1, 1, 1]} : vector<2x16x32xf32> to vector<2x1x32xf32>
      %203 = vector.shape_cast %202 : vector<2x1x32xf32> to vector<2x32xf32>
      %c0_79 = arith.constant 0 : index
      %c0_80 = arith.constant 0 : index
      %204 = vector.load %arg15[%c0_79, %c0_80] : memref<1x32xf32, #tpu.memory_space<vmem>>, vector<1x32xf32>
      %c0_81 = arith.constant 0 : index
      %c0_82 = arith.constant 0 : index
      %205 = vector.load %arg16[%c0_81, %c0_82] : memref<1x32xf32, #tpu.memory_space<vmem>>, vector<1x32xf32>
      %cst_83 = arith.constant dense<0.000000e+00> : vector<2xf32>
      %206 = vector.multi_reduction <add>, %203, %cst_83 [1] : vector<2x32xf32> to vector<2xf32>
      %207 = vector.shape_cast %206 : vector<2xf32> to vector<2x1xf32>
      %cst_84 = arith.constant 3.200000e+01 : f32
      %208 = vector.broadcast %cst_84 : f32 to vector<2x1xf32>
      %209 = arith.divf %207, %208 : vector<2x1xf32>
      %210 = vector.broadcast %209 : vector<2x1xf32> to vector<2x32xf32>
      %211 = arith.subf %203, %210 : vector<2x32xf32>
      %212 = arith.mulf %211, %211 : vector<2x32xf32>
      %cst_85 = arith.constant dense<0.000000e+00> : vector<2xf32>
      %213 = vector.multi_reduction <add>, %212, %cst_85 [1] : vector<2x32xf32> to vector<2xf32>
      %214 = vector.shape_cast %213 : vector<2xf32> to vector<2x1xf32>
      %cst_86 = arith.constant 3.200000e+01 : f32
      %215 = vector.broadcast %cst_86 : f32 to vector<2x1xf32>
      %216 = arith.divf %214, %215 : vector<2x1xf32>
      %217 = vector.broadcast %209 : vector<2x1xf32> to vector<2x32xf32>
      %218 = arith.subf %203, %217 : vector<2x32xf32>
      %cst_87 = arith.constant 9.99999974E-6 : f32
      %219 = vector.broadcast %cst_87 : f32 to vector<2x1xf32>
      %220 = arith.addf %216, %219 : vector<2x1xf32>
      %221 = math.rsqrt %220 : vector<2x1xf32>
      %222 = vector.broadcast %221 : vector<2x1xf32> to vector<2x32xf32>
      %223 = arith.mulf %218, %222 : vector<2x32xf32>
      %224 = vector.broadcast %204 : vector<1x32xf32> to vector<2x32xf32>
      %225 = arith.mulf %223, %224 : vector<2x32xf32>
      %226 = vector.broadcast %205 : vector<1x32xf32> to vector<2x32xf32>
      %227 = arith.addf %225, %226 : vector<2x32xf32>
      %c0_88 = arith.constant 0 : index
      %c0_89 = arith.constant 0 : index
      %228 = vector.load %arg17[%c0_88, %c0_89] : memref<32x32xbf16, #tpu.memory_space<vmem>>, vector<32x32xbf16>
      %229 = arith.truncf %227 : vector<2x32xf32> to vector<2x32xbf16>
      %cst_90 = arith.constant dense<0.000000e+00> : vector<2x32xf32>
      %230 = tpu.matmul %229, %228, %cst_90 {dimension_numbers = #tpu.dot_dimension_numbers<[1], [0], [0], [1], [0, 0, 1, 1], [], []>} : vector<2x32xbf16>, vector<32x32xbf16>, vector<2x32xf32> -> vector<2x32xf32>
      %231 = vector.shape_cast %230 : vector<2x32xf32> to vector<2x1x32xf32>
      %c0_91 = arith.constant 0 : index
      %c0_92 = arith.constant 0 : index
      %c0_93 = arith.constant 0 : index
      %232 = vector.load %arg18[%c0_91, %c0_92, %c0_93] : memref<2x1x32xf32, #tpu.memory_space<vmem>>, vector<2x1x32xf32>
      tpu.vector_store %arg18[%c0_91, %c0_92, %c0_93], %231 {strides = array<i32>} : memref<2x1x32xf32, #tpu.memory_space<vmem>>, vector<2x1x32xf32>,
    } else {
    }
    return
  }
  func.func @transform_0(%arg0: i32, %arg1: i32) -> (i32, i32, i32) {
    %c0_i32 = arith.constant 0 : i32
    %c0_i32_0 = arith.constant 0 : i32
    %c0_i32_1 = arith.constant 0 : i32
    return %arg0, %c0_i32, %c0_i32_0 : i32, i32, i32
  }
  func.func @transform_1(%arg0: i32, %arg1: i32) -> (i32, i32, i32) {
    %c0_i32 = arith.constant 0 : i32
    %c0_i32_0 = arith.constant 0 : i32
    %c0_i32_1 = arith.constant 0 : i32
    return %arg1, %c0_i32, %c0_i32_0 : i32, i32, i32
  }
  func.func @transform_2(%arg0: i32, %arg1: i32) -> (i32, i32, i32) {
    %c0_i32 = arith.constant 0 : i32
    %c0_i32_0 = arith.constant 0 : i32
    %c0_i32_1 = arith.constant 0 : i32
    return %arg1, %c0_i32, %c0_i32_0 : i32, i32, i32
  }
  func.func @transform_3(%arg0: i32, %arg1: i32) -> (i32, i32, i32) {
    %c0_i32 = arith.constant 0 : i32
    %c0_i32_0 = arith.constant 0 : i32
    %c0_i32_1 = arith.constant 0 : i32
    return %arg1, %c0_i32, %c0_i32_0 : i32, i32, i32
  }
  func.func @transform_4(%arg0: i32, %arg1: i32) -> (i32, i32, i32) {
    %c0_i32 = arith.constant 0 : i32
    %c0_i32_0 = arith.constant 0 : i32
    %c0_i32_1 = arith.constant 0 : i32
    return %arg1, %c0_i32, %c0_i32_0 : i32, i32, i32
  }
  func.func @transform_5(%arg0: i32, %arg1: i32) -> (i32, i32, i32) {
    %c0_i32 = arith.constant 0 : i32
    %c0_i32_0 = arith.constant 0 : i32
    %c0_i32_1 = arith.constant 0 : i32
    return %arg1, %c0_i32, %c0_i32_0 : i32, i32, i32
  }
  func.func @transform_6(%arg0: i32, %arg1: i32) -> (i32, i32, i32) {
    %c0_i32 = arith.constant 0 : i32
    %c0_i32_0 = arith.constant 0 : i32
    %c0_i32_1 = arith.constant 0 : i32
    return %arg1, %c0_i32, %c0_i32_0 : i32, i32, i32
  }
  func.func @transform_7(%arg0: i32, %arg1: i32) -> (i32, i32, i32) {
    %c0_i32 = arith.constant 0 : i32
    %c0_i32_0 = arith.constant 0 : i32
    %c0_i32_1 = arith.constant 0 : i32
    return %arg1, %c0_i32, %c0_i32_0 : i32, i32, i32
  }
  func.func @transform_8(%arg0: i32, %arg1: i32) -> (i32, i32, i32) {
    %c0_i32 = arith.constant 0 : i32
    %c0_i32_0 = arith.constant 0 : i32
    %c0_i32_1 = arith.constant 0 : i32
    return %arg1, %c0_i32, %c0_i32_0 : i32, i32, i32
  }
  func.func @transform_9(%arg0: i32, %arg1: i32) -> (i32, i32, i32) {
    %c0_i32 = arith.constant 0 : i32
    %c0_i32_0 = arith.constant 0 : i32
    %c0_i32_1 = arith.constant 0 : i32
    return %arg1, %c0_i32, %c0_i32_0 : i32, i32, i32
  }
  func.func @transform_10(%arg0: i32, %arg1: i32) -> (i32, i32, i32) {
    %c0_i32 = arith.constant 0 : i32
    %c0_i32_0 = arith.constant 0 : i32
    %c0_i32_1 = arith.constant 0 : i32
    return %arg1, %c0_i32, %c0_i32_0 : i32, i32, i32
  }
  func.func @transform_11(%arg0: i32, %arg1: i32) -> (i32, i32, i32) {
    %c0_i32 = arith.constant 0 : i32
    %c0_i32_0 = arith.constant 0 : i32
    %c0_i32_1 = arith.constant 0 : i32
    return %arg1, %c0_i32, %c0_i32_0 : i32, i32, i32
  }
  func.func @transform_12(%arg0: i32, %arg1: i32) -> (i32, i32, i32) {
    %c0_i32 = arith.constant 0 : i32
    %c0_i32_0 = arith.constant 0 : i32
    %c0_i32_1 = arith.constant 0 : i32
    return %arg1, %c0_i32, %c0_i32_0 : i32, i32, i32
  }
  func.func @transform_13(%arg0: i32, %arg1: i32) -> (i32, i32) {
    %c0_i32 = arith.constant 0 : i32
    %c0_i32_0 = arith.constant 0 : i32
    %c0_i32_1 = arith.constant 0 : i32
    return %c0_i32, %c0_i32_0 : i32, i32
  }
  func.func @transform_14(%arg0: i32, %arg1: i32) -> (i32, i32) {
    %c0_i32 = arith.constant 0 : i32
    %c0_i32_0 = arith.constant 0 : i32
    %c0_i32_1 = arith.constant 0 : i32
    return %c0_i32, %c0_i32_0 : i32, i32
  }
  func.func @transform_15(%arg0: i32, %arg1: i32) -> (i32, i32) {
    %c0_i32 = arith.constant 0 : i32
    %c0_i32_0 = arith.constant 0 : i32
    %c0_i32_1 = arith.constant 0 : i32
    return %c0_i32, %c0_i32_0 : i32, i32
  }
  func.func @transform_16(%arg0: i32, %arg1: i32) -> (i32, i32, i32) {
    %c0_i32 = arith.constant 0 : i32
    %c0_i32_0 = arith.constant 0 : i32
    %c0_i32_1 = arith.constant 0 : i32
    return %arg0, %c0_i32, %c0_i32_0 : i32, i32, i32
  }
}

</mosaic_0001>

<bundles_post_ra>
// kernel: clip_text_encode.1
= control target key start
LH: loop header
LB: loop body
LE: loop exit
PB: predicated region body
PF: predicated region fallthrough
CT: control target
= control target key end

     0   :  { %s3490_s0 = inlined_call_operand.vmem [shape: f32[4,16,32], index: 0, kind: input, shape index: {}]   ;;  %s3491_s1 = inlined_call_operand.vmem [shape: f32[2,1,32], index: 1, kind: input, shape index: {}, may-alias: {1,7}]   ;;  %s3492_s2 = inlined_call_operand.vmem [shape: f32[2,1,32], index: 2, kind: input, shape index: {}, may-alias: {2,6,8,12}]   ;;  %s3493_s3 = inlined_call_operand.vmem [shape: bf16[2,32,96], index: 3, kind: input, shape index: {}]   ;;  %s3494_s4 = inlined_call_operand.vmem [shape: f32[2,1,96], index: 4, kind: input, shape index: {}]   ;;  %s3495_s5 = inlined_call_operand.vmem [shape: bf16[2,32,32], index: 5, kind: input, shape index: {}]   ;;  %s3496_s6 = inlined_call_operand.vmem [shape: f32[2,1,32], index: 6, kind: input, shape index: {}, may-alias: {2,6,8,12}]   ;;  %s3497_s7 = inlined_call_operand.vmem [shape: f32[2,1,32], index: 7, kind: input, shape index: {}, may-alias: {1,7}]   ;;  %s3498_s8 = inlined_call_operand.vmem [shape: f32[2,1,32], index: 8, kind: input, shape index: {}, may-alias: {2,6,8,12}]   ;;  %s3499_s9 = inlined_call_operand.vmem [shape: bf16[2,32,128], index: 9, kind: input, shape index: {}]   ;;  %s3500_s10 = inlined_call_operand.vmem [shape: f32[2,1,128], index: 10, kind: input, shape index: {}]   ;;  %s3501_s11 = inlined_call_operand.vmem [shape: bf16[2,128,32], index: 11, kind: input, shape index: {}]   ;;  %s3502_s12 = inlined_call_operand.vmem [shape: f32[2,1,32], index: 12, kind: input, shape index: {}, may-alias: {2,6,8,12}]   ;;  %s3503_s13 = inlined_call_operand.vmem [shape: f32[1,32], index: 13, kind: input, shape index: {}]   ;;  %s3504_s14 = inlined_call_operand.vmem [shape: f32[1,32], index: 14, kind: input, shape index: {}]   ;;  %s3505_s15 = inlined_call_operand.vmem [shape: bf16[32,32], index: 15, kind: input, shape index: {}]   ;;  %s3506_s16 = inlined_call_operand.hbm [shape: f32[4,1,32], index: 16, kind: output, shape index: {}]  }
   0x1   :  { %3523 = sst [smem:[#allocation19_spill]] %s3490_s0 }
   0x2   :  { %3524 = sst [smem:[#allocation20_spill]] %s3493_s3 }
   0x3   :  { %3525 = sst [smem:[#allocation21_spill]] %s3495_s5 }
   0x4   :  { %3526 = sst [smem:[#allocation22_spill]] %s3497_s7 }
   0x5   :  { %3527 = sst [smem:[#allocation23_spill]] %s3501_s11 }
   0x6   :  { %3528 = sst [smem:[#allocation24_spill]] %s3503_s13 }
   0x7   :  { %3529 = sst [smem:[#allocation25_spill]] %s3504_s14 }
   0x8   :  { %3530 = sst [smem:[#allocation26_spill]] %s3505_s15 }
   0x9   :  { %3531 = sst [smem:[#allocation27_spill]] %s3506_s16 }
   0xa   :  { %21 = vsyncpa [#allocation4], 0 }
   0xb   :  { %23 = vsyncpa [#allocation4 + $0x1], 0  ;;  %s2879_s21 = smov 0   ;;  %s2881_s22 = smov 0  }
   0xc   :  { %s2883_s23 = smov 0   ;;  %s2885_s24 = smov 0  }
   0xd   :  { %s2887_s25 = smov 0   ;;  %s2889_s26 = smov 0  }
   0xe   :  { %s2891_s27 = smov 0   ;;  %s2893_s28 = smov 0  }
   0xf LB: > { %3532 = sst [smem:[#allocation6_spill]] %s2748_s21  ;;  %s2316_s29 = sadd.s32 4294967295, %s2776_s28   ;;  %s2776_s28 = sphi %s2893_s28, %s29_s28   ;;  %s2772_s27 = sphi %s2891_s27, %s3581_s27   ;;  %s2768_s26 = sphi %s2889_s26, %s3580_s26   ;;  %s2764_s25 = sphi %s2887_s25, %s3579_s25   ;;  %s2760_s24 = sphi %s2885_s24, %s3578_s24   ;;  %s2756_s23 = sphi %s2883_s23, %s3577_s23   ;;  %s2752_s22 = sphi %s2881_s22, %s3576_s22   ;;  %s2748_s21 = sphi %s2879_s21, %s3575_s21  }
  0x10   : > { %3533 = sst [smem:[#allocation7_spill]] %s2752_s22  ;;  %s2317_s30 = sadd.s32 4294967294, %s2776_s28  }
  0x11   : > { %3534 = sst [smem:[#allocation8_spill]] %s2756_s23  ;;  %s38_s0 = sadd.s32 1, %s2768_s26 }
  0x12   : > { %3535 = sst [smem:[#allocation9_spill]] %s2760_s24  ;;  %p39_p0 = scmp.ge.s32.totalorder %s38_s0, 2 }
  0x13   : > { %3536 = sst [smem:[#allocation10_spill]] %s2768_s26  ;;  %s41_s17 = sadd.s32 1, %s2772_s27 }
  0x14   : > { %3537 = sst [smem:[#allocation11_spill]] %s2772_s27  ;;  %p459_p1 = scmp.ne.s32.totalorder %s2756_s23, %s2752_s22 }
  0x15   : > { %3538 = sst [smem:[#allocation12_spill]] %s2776_s28  ;;  %p460_p2 = scmp.eq.s32.totalorder %s2316_s29, 3 }
  0x16   : > { %s3583_s0 = smov (%p39_p0, %s38_s0), 0  ;;  %s3585_s17 = smov (!%p39_p0, %s41_s17), %s2772_s27 }
  0x17   : > { %3539 = sst [smem:[#allocation13_spill]] %s3583_s0  ;;  %p2926_p3 = por %p460_p2, %p459_p1 }
  0x18   : > { %p465_p4 = scmp.ne.s32.totalorder %s2752_s22, %s2748_s21  ;;  %p43_p5 = scmp.ge.s32.totalorder %s3585_s17, 2 }
  0x19   : > { %s3540_s18 = scalar_select %p2926_p3, 1, 0 }
  0x1a   : > { %p466_p6 = scmp.eq.s32.totalorder %s2317_s30, 3  ;;  %p2320_p7 = scmp.ge.s32.totalorder %s2776_s28, 1 }
  0x1b   : > { %3541 = sst [smem:[#allocation14_spill]] %s3540_s18  ;;  %p583_p8 = scmp.lt.s32.totalorder %s2776_s28, 5 }
  0x1c   : > { %s3587_s17 = smov (%p43_p5, %s3585_s17), 0  ;;  %p2936_p9 = por %p466_p6, %p465_p4 }
  0x1d   : > { %3542 = sst [smem:[#allocation15_spill]] %s3587_s17  ;;  %p584_p10 = pnand %p2320_p7, %p583_p8 }
  0x1e   : > { %s3543_s19 = scalar_select %p2936_p9, 1, 0 }
  0x1f   : > { %s446_s20 = ssub.s32 %s2772_s27, %s3587_s17  ;;  %s449_s29 = sadd.s32 1, %s2756_s23 }
  0x20   : > { %3544 = sst [smem:[#allocation16_spill]] %s3543_s19  ;;  %p447_p11 = scmp.eq.s32.totalorder %s446_s20, 0 }
  0x21   : > { %587 = sbr.rel (%p584_p10) target bundleno = 2548 (0x9f4), region = 84 }
  0x22   : > { %s2944_s0 = scalar_select %p447_p11, %s2756_s23, %s449_s29  }
  0x24   : > { %3545 = sst [smem:[#allocation17_spill]] %s2944_s0 }
  0x26   : > { %s3512_s30 = sand.u32 1, %s2752_s22   ;;  %s2947_s26 = sshll.u32 %s2764_s25, 1 }
  0x27   : > { %3546 = sst [smem:[#allocation18_spill]] %s2947_s26  ;;  %s2321_s21 = sshll.u32 %s3512_s30, 1 }
  0x28   : > { %p679_p12 = scmp.lt.s32.totalorder %s2947_s26, 3  ;;  %p685_p13 = scmp.lt.s32.totalorder %s2760_s24, 1 }
  0x29   : > { %s3547_s27 = sld [smem:[#allocation19_spill]]  ;;  %s3014_s13 = scalar_lea.vmem [#allocation3], %s2321_s21 }
  0x2a   : > { %s680_s19 = scalar_select %p679_p12, %s2947_s26, 3 }
  0x2b   : > { %s2955_s17 = scalar_select %p685_p13, %s2760_s24, 1 }
  0x2c   : > { %s2430_s25 = sshll.u32 %s680_s19, 4  ;;  %s3548_s3 = sld [smem:[#allocation20_spill]] }
  0x2d   : > { %s2431_s26 = sshll.u32 %s2955_s17, 4  ;;  %s3549_s5 = sld [smem:[#allocation21_spill]] }
  0x2e   : > { %s712_s28 = scalar_lea.vmem %s3498_s8, %s2955_s17  ;;  %s2998_s19 = scalar_lea.vmem %s3499_s9, %s2431_s26 }
  0x2f   : > { %s683_s30 = scalar_lea.vmem %s3547_s27, %s2430_s25  ;;  %s720_s11 = scalar_lea.vmem %s3500_s10, %s2955_s17 }
  0x30   : > { %s728_s22 = scalar_lea.vmem %s3502_s12, %s2955_s17  ;;  %s3551_s16 = sld [smem:[#allocation23_spill]] }
  0x31   : > { %s3552_s14 = sld [smem:[#allocation9_spill]] }
  0x32   : > { %s2972_s15 = scalar_lea.vmem %s3548_s3, %s2431_s26 }
  0x33   : > { %s2981_s25 = scalar_lea.vmem %s3549_s5, %s2431_s26  ;;  %s2434_s5 = sshll.u32 %s2955_s17, 6 }
  0x36   : > { %s3012_s7 = scalar_lea.vmem %s3551_s16, %s2434_s5 }
  0x37   : > { %p2333_p0 = scmp.ne.s32.totalorder %s3552_s14, 0 }
  0x39   : > { %734 = sbr.rel (%p2333_p0) target bundleno = 67 (0x43), region = 88 }
  0x3e   : > { %v735_v0 = vld [vmem:[%s683_s30] sm:$0xff]  ;;  %vm739_vm0 = vcmask 261120   ;;  %v736_v1 = vld [vmem:[%s683_s30 + $0x8] sm:$0xff]  ;;  %v737_v2 = vld [vmem:[%s683_s30 + $0x10] sm:$0xff] }
  0x3f   : > { %740 = vst.msk [vmem:[#allocation2] sm:$0xff] %vm739_vm0, %v735_v0  ;;  %v738_v3 = vld [vmem:[%s683_s30 + $0x18] sm:$0xff] }
  0x40   : > { %741 = vst.msk [vmem:[#allocation2 + $0x8] sm:$0xff] %vm739_vm0, %v736_v1 }
  0x41   : > { %742 = vst.msk [vmem:[#allocation2 + $0x10] sm:$0xff] %vm739_vm0, %v737_v2 }
  0x42   : > { %743 = vst.msk [vmem:[#allocation2 + $0x18] sm:$0xff] %vm739_vm0, %v738_v3 }
  0x43 PF: > { %vm750_vm1 = vcmask 261120   ;;  %v2778_v12 = vmov 32.0   ;;  %v2436_v39 = vld [vmem:[%s2972_s15 + $0x8] sm:$0xff]  ;;  %v2435_v43 = vld [vmem:[%s2972_s15] sm:$0xff]  ;;  %s3553_s15 = scalar_lea.vmem %s3491_s1, %s2955_s17  ;;  %s3554_s26 = scalar_lea.vmem %s3492_s2, %s2955_s17  ;;  %vm938_vm15 = vcmask 64512  }
  0x44   : > { %2576 = vrcp.f32 %v2778_v12  ;;  %894 = vmatpush.bf16.msra.mxu0 %v2436_v39  ;;  %s3555_s20 = scalar_lea.vmem %s3494_s4, %s2955_s17  ;;  %s2779_s27 = smov 88  }
  0x45   : > { %s2780_s23 = smov 96   ;;  %s2781_s0 = smov 120  }
  0x46   : > { %v744_v5 = vld [vmem:[#allocation2] sm:$0xff]  ;;  %s2782_s18 = smov 112   ;;  %s2783_s29 = smov 72  }
  0x47   : > { %v751_v7 = vsel %vm750_vm1, %v744_v5, 0.0  ;;  %v745_v9 = vld [vmem:[#allocation2 + $0x8] sm:$0xff]  ;;  %s2784_s14 = smov 80   ;;  %s2785_s3 = smov 104  }
  0x48   : > { %v746_v4 = vld [vmem:[#allocation2 + $0x10] sm:$0xff]  ;;  %752 = vadd.xlane.f32.xlu0 %v751_v7  ;;  %v754_v11 = vsel %vm750_vm1, %v745_v9, 0.0  ;;  %895 = vmatpush.bf16.msra.mxu0 %v2435_v43  ;;  %s2786_s5 = smov 64   ;;  %s2788_s16 = smov 48  }
  0x49   : > { %v757_v6 = vsel %vm750_vm1, %v746_v4, 0.0  ;;  %v747_v8 = vld [vmem:[#allocation2 + $0x18] sm:$0xff]  ;;  %s2789_s21 = smov 40   ;;  %s2791_s30 = smov 16  }
  0x4a   : > { %758 = vadd.xlane.f32.xlu1 %v757_v6  ;;  %v760_v10 = vsel %vm750_vm1, %v747_v8, 0.0  ;;  %v2577_v13 = vpop.eup %2576  ;;  %s2792_s24 = smov 24  }
  0x4b   : > { %v764_v14 = vmul.f32 32.0, %v2577_v13  ;;  %vm768_vm2 = vweird.f32 %v2577_v13 }
  0x4d   : > { %v765_v15 = vsub.f32 1.0, %v764_v14 }
  0x4f   : > { %v766_v16 = vmul.f32 %v2577_v13, %v765_v15 }
  0x50   : > { %755 = vadd.xlane.f32.xlu0 %v754_v11 }
  0x51   : > { %v767_v17 = vadd.f32 %v2577_v13, %v766_v16  ;;  %v2569_v16 = vld [vmem:[%s3554_s26] ss:$0 sm:$0xff]  ;;  %s2790_s26 = smov 8  }
  0x52   : > { %761 = vadd.xlane.f32.xlu1 %v760_v10 }
  0x53   : > { %v3021_v18 = vsel %vm768_vm2, %v2577_v13, %v767_v17  ;;  %vm999_vm2 = vcmask 130048  }
  0xbb   : > { %v753_v20 = vpop.xlane.xlu0 %752 }
  0xbc   : > { %v770_v22 = vmul.f32 %v3021_v18, %v753_v20 }
  0xbd   : > { %v759_v19 = vpop.xlane.xlu1 %758 }
  0xbe   : > { %v772_v21 = vmul.f32 %v3021_v18, %v759_v19  ;;  %v774_v24 = vsub.f32 %v744_v5, %v770_v22 }
  0xc0   : > { %v3025_v23 = vsub.f32 %v746_v4, %v772_v21  ;;  %v778_v26 = vmul.f32 %v774_v24, %v774_v24 }
  0xc2   : > { %v780_v25 = vmul.f32 %v3025_v23, %v3025_v23  ;;  %v782_v28 = vsel %vm750_vm1, %v778_v26, 0.0 }
  0xc3   : > { %783 = vadd.xlane.f32.xlu2 %v782_v28  ;;  %v756_v30 = vpop.xlane.xlu0 %755 }
  0xc4   : > { %v788_v27 = vsel %vm750_vm1, %v780_v25, 0.0  ;;  %v771_v32 = vmul.f32 %v3021_v18, %v756_v30 }
  0xc5   : > { %v762_v29 = vpop.xlane.xlu1 %761  ;;  %789 = vadd.xlane.f32.xlu0 %v788_v27 }
  0xc6   : > { %v773_v31 = vmul.f32 %v3021_v18, %v762_v29  ;;  %v775_v34 = vsub.f32 %v745_v9, %v771_v32  ;;  %v2568_v9 = vld [vmem:[%s3553_s15] ss:$0 sm:$0xff]  ;;  %s2787_s15 = smov 56  }
  0xc8   : > { %v3033_v33 = vsub.f32 %v747_v8, %v773_v31  ;;  %v779_v36 = vmul.f32 %v775_v34, %v775_v34 }
  0xca   : > { %v781_v35 = vmul.f32 %v3033_v33, %v3033_v33  ;;  %v785_v38 = vsel %vm750_vm1, %v779_v36, 0.0 }
  0xcb   : > { %786 = vadd.xlane.f32.xlu2 %v785_v38 }
  0xcc   : > { %v791_v37 = vsel %vm750_vm1, %v781_v35, 0.0 }
  0xcd   : > { %792 = vadd.xlane.f32.xlu1 %v791_v37  ;;  %v2570_v37 = vld [vmem:[%s3555_s20] ss:$0 sm:$0xff] }
 0x136   : > { %v784_v40 = vpop.xlane.xlu2 %783 }
 0x137   : > { %v794_v41 = vmul.f32 %v784_v40, %v3021_v18 }
 0x138   : > { %v790_v42 = vpop.xlane.xlu0 %789 }
 0x139   : > { %v798_v44 = vadd.f32 1e-05, %v794_v41  ;;  %v796_v45 = vmul.f32 %v790_v42, %v3021_v18 }
 0x13b   : > { %2578 = vrsqrt.f32 %v798_v44  ;;  %v800_v46 = vadd.f32 1e-05, %v796_v45  ;;  %vm808_vm4 = vweird.f32 %v798_v44 }
 0x13d   : > { %2580 = vrsqrt.f32 %v800_v46  ;;  %vm828_vm11 = vweird.f32 %v800_v46 }
 0x13e   : > { %v787_v48 = vpop.xlane.xlu2 %786 }
 0x13f   : > { %v795_v50 = vmul.f32 %v787_v48, %v3021_v18 }
 0x140   : > { %v793_v47 = vpop.xlane.xlu1 %792 }
 0x141   : > { %v797_v49 = vmul.f32 %v793_v47, %v3021_v18  ;;  %v2579_v51 = vpop.eup %2578  ;;  %v799_v53 = vadd.f32 1e-05, %v795_v50 }
 0x142   : > { %v803_v54 = vmul.f32 %v2579_v51, %v798_v44  ;;  %vm809_vm3 = vweird.f32 %v2579_v51 }
 0x143   : > { %v801_v52 = vadd.f32 1e-05, %v797_v49  ;;  %v2581_v57 = vpop.eup %2580  ;;  %vm810_vm5 = vmor %vm808_vm4, %vm809_vm3  ;;  %vm818_vm7 = vweird.f32 %v799_v53  ;;  %vm1604_vm4 = vcmask 195584  }
 0x144   : > { %v804_v55 = vmul.f32 %v2579_v51, %v803_v54  ;;  %v823_v63 = vmul.f32 %v2581_v57, %v800_v46  ;;  %vm829_vm12 = vweird.f32 %v2581_v57 }
 0x145   : > { %2582 = vrsqrt.f32 %v801_v52  ;;  %vm838_vm9 = vweird.f32 %v801_v52  ;;  %vm830_vm14 = vmor %vm828_vm11, %vm829_vm12 }
 0x146   : > { %2584 = vrsqrt.f32 %v799_v53  ;;  %v805_v56 = vmul.f32 0.5, %v804_v55  ;;  %v824_v4 = vmul.f32 %v2581_v57, %v823_v63 }
 0x148   : > { %v806_v58 = vsub.f32 1.5, %v805_v56  ;;  %v825_v10 = vmul.f32 0.5, %v824_v4 }
 0x14a   : > { %v807_v62 = vmul.f32 %v2579_v51, %v806_v58  ;;  %v826_v17 = vsub.f32 1.5, %v825_v10 }
 0x14b   : > { %v2583_v59 = vpop.eup %2582 }
 0x14c   : > { %v2585_v60 = vpop.eup %2584  ;;  %v833_v61 = vmul.f32 %v2583_v59, %v801_v52  ;;  %v811_v3 = vsel %vm810_vm5, %v2579_v51, %v807_v62  ;;  %vm839_vm10 = vweird.f32 %v2583_v59 }
 0x14d   : > { %v813_v0 = vmul.f32 %v2585_v60, %v799_v53  ;;  %vm819_vm6 = vweird.f32 %v2585_v60  ;;  %v842_v8 = vmul.f32 %v811_v3, %v774_v24  ;;  %vm840_vm13 = vmor %vm838_vm9, %vm839_vm10  ;;  %v827_v24 = vmul.f32 %v2581_v57, %v826_v17 }
 0x14e   : > { %v834_v1 = vmul.f32 %v2583_v59, %v833_v61  ;;  %vm820_vm8 = vmor %vm818_vm7, %vm819_vm6 }
 0x14f   : > { %v814_v2 = vmul.f32 %v2585_v60, %v813_v0  ;;  %v849_v15 = vmul.f32 %v2568_v9, %v842_v8  ;;  %v831_v27 = vsel %vm830_vm14, %v2581_v57, %v827_v24 }
 0x150   : > { %v835_v6 = vmul.f32 0.5, %v834_v1  ;;  %v844_v29 = vmul.f32 %v831_v27, %v3025_v23 }
 0x151   : > { %v815_v5 = vmul.f32 0.5, %v814_v2  ;;  %v856_v21 = vadd.f32 %v2569_v16, %v849_v15 }
 0x152   : > { %v836_v12 = vsub.f32 1.5, %v835_v6  ;;  %v851_v31 = vmul.f32 %v2568_v9, %v844_v29 }
 0x153   : > { %v816_v7 = vsub.f32 1.5, %v815_v5 }
 0x154   : > { %v837_v20 = vmul.f32 %v2583_v59, %v836_v12 }
 0x155   : > { %v817_v11 = vmul.f32 %v2585_v60, %v816_v7 }
 0x156   : > { %v841_v26 = vsel %vm840_vm13, %v2583_v59, %v837_v20 }
 0x157   : > { %v821_v13 = vsel %vm820_vm8, %v2585_v60, %v817_v11  ;;  %v845_v28 = vmul.f32 %v841_v26, %v3033_v33 }
 0x158   : > { %v843_v14 = vmul.f32 %v821_v13, %v775_v34  ;;  %v858_v34 = vadd.f32 %v2569_v16, %v851_v31 }
 0x159   : > { %v852_v30 = vmul.f32 %v2568_v9, %v845_v28 }
 0x15a   : > { %v850_v19 = vmul.f32 %v2568_v9, %v843_v14 }
 0x15b   : > { %v859_v32 = vadd.f32 %v2569_v16, %v852_v30  ;;  %v919_v30 = vlaneseq }
 0x15c   : > { %v857_v22 = vadd.f32 %v2569_v16, %v850_v19 }
 0x15d   : > { %v865_v35 = vpack.c.bf16 %v859_v32, %v858_v34  ;;  %v920_v31 = vshrl.u32 %v919_v30, 7  ;;  %v923_v32 = vand.u32 127, %v919_v30 }
 0x15e   : > { %v864_v25 = vpack.c.bf16 %v857_v22, %v856_v21 }
 0x15f   : > { %vm3096_vm0 = vcmp.le.s32.totalorder %v923_v32, %v920_v31 }
 0x160   : > { %2342 = vmatmul.msk.bf16.vlgmr.msra.gmra.mxu0 %vm750_vm1, %v864_v25 }
 0x170   : > { %2343 = vmatmul.msk.bf16.gmra.mxu0 %vm750_vm1, %v865_v35 }
 0x1dd   : > { %v897_v36 = vpop.f32.mrf.mxu0 }
 0x1de   : > { %v898_v38 = vadd.f32 %v2570_v37, %v897_v36 }
 0x1e0   : > { %v915_v40 = vpack.c.bf16 %v898_v38, %v898_v38  ;;  %v907_v54 = vmul.f32 0.35355338, %v898_v38 }
 0x1e2   : > { %v933_v42 = vunpack.c.l.b16 %v915_v40  ;;  %v911_v62 = vpack.c.bf16 %v907_v54, %v907_v54 }
 0x1e4   : > { %v928_v1 = vunpack.c.l.b16 %v911_v62 }
 0x1e5   : > { %v899_v39 = vpop.f32.mrf.mxu0 }
 0x1e6   : > { %v900_v41 = vadd.f32 %v2570_v37, %v899_v39  ;;  %v921_v39 = vadd.s32 8, %v920_v31 }
 0x1e8   : > { %v916_v33 = vpack.c.bf16 %v900_v41, %v900_v41  ;;  %v908_v50 = vmul.f32 0.35355338, %v900_v41  ;;  %vm3112_vm3 = vcmp.le.s32.totalorder %v923_v32, %v921_v39 }
 0x1ea   : > { %v934_v23 = vunpack.c.l.b16 %v916_v33  ;;  %v912_v58 = vpack.c.bf16 %v908_v50, %v908_v50 }
 0x1ec   : > { %v3064_v43 = vpack.c.b16 %v934_v23, %v933_v42  ;;  %v929_v0 = vunpack.c.l.b16 %v912_v58 }
 0x1ed   : > { %v902_v44 = vpop.f32.mrf.mxu0 }
 0x1ee   : > { %1100 = vrot.lane.b32.xlu1 %v3064_v43, %s2779_s27  ;;  %936 = vrot.lane.b32.xlu0 %v3064_v43, %s2780_s23  ;;  %v903_v45 = vadd.f32 %v2570_v37, %v902_v44  ;;  %v930_v2 = vpack.c.b16 %v929_v0, %v928_v1 }
 0x1f0   : > { %v909_v46 = vmul.f32 0.35355338, %v903_v45  ;;  %v917_v48 = vpack.c.bf16 %v903_v45, %v903_v45 }
 0x1f2   : > { %v913_v51 = vpack.c.bf16 %v909_v46, %v909_v46  ;;  %v966_v55 = vunpack.c.l.b16 %v917_v48 }
 0x1f4   : > { %v961_v59 = vunpack.c.l.b16 %v913_v51 }
 0x1f5   : > { %v904_v47 = vpop.f32.mrf.mxu0 }
 0x1f6   : > { %v905_v49 = vadd.f32 %v2570_v37, %v904_v47 }
 0x1f8   : > { %v910_v52 = vmul.f32 0.35355338, %v905_v49  ;;  %v918_v53 = vpack.c.bf16 %v905_v49, %v905_v49 }
 0x1fa   : > { %v914_v56 = vpack.c.bf16 %v910_v52, %v910_v52  ;;  %v967_v57 = vunpack.c.l.b16 %v918_v53 }
 0x1fc   : > { %v962_v60 = vunpack.c.l.b16 %v914_v56  ;;  %v3068_v61 = vpack.c.b16 %v967_v57, %v966_v55 }
 0x1fe   : > { %v963_v63 = vpack.c.b16 %v962_v60, %v961_v59  ;;  %1124 = vrot.lane.b32.xlu0 %v3068_v61, %s2779_s27  ;;  %969 = vrot.lane.b32.xlu2 %v3068_v61, %s2780_s23  ;;  %s3560_s27 = scalar_lea.vmem %s3496_s6, %s2955_s17 }
 0x200   : > { %1122 = vrot.lane.b32.xlu1 %v963_v63, %s2781_s0 }
 0x206   : > { %1248 = vrot.lane.b32.xlu0 %v930_v2, %s2782_s18  ;;  %1098 = vrot.lane.b32.xlu2 %v930_v2, %s2781_s0  ;;  %s3561_s0 = sld [smem:[#allocation22_spill]] }
 0x208   : > { %1400 = vrot.lane.b32.xlu1 %v3064_v43, %s2783_s29 }
 0x20e   : > { %1250 = vrot.lane.b32.xlu2 %v3064_v43, %s2784_s14  ;;  %1272 = vrot.lane.b32.xlu0 %v963_v63, %s2782_s18  ;;  %s3562_s18 = scalar_lea.vmem %s3561_s0, %s2955_s17  ;;  %s3563_s17 = sld [smem:[#allocation9_spill]] }
 0x210   : > { %1424 = vrot.lane.b32.xlu1 %v3068_v61, %s2783_s29 }
 0x214   : > { %p2416_p1 = scmp.ne.s32.totalorder %s3563_s17, 1 }
 0x216   : > { %1274 = vrot.lane.b32.xlu2 %v3068_v61, %s2784_s14  ;;  %1422 = vrot.lane.b32.xlu0 %v963_v63, %s2785_s3 }
 0x218   : > { %1078 = vrot.lane.b32.xlu1 %v3068_v61, %s2786_s5 }
 0x21e   : > { %1398 = vrot.lane.b32.xlu2 %v930_v2, %s2785_s3 }
 0x220   : > { %1203 = vrot.lane.b32.xlu1 %v3064_v43, %s2787_s15 }
 0x228   : > { %1053 = vrot.lane.b32.xlu1 %v3064_v43, %s2786_s5 }
 0x258   : > { %v970_v3 = vpop.permute.xlu2 %969 }
 0x259   : > { %v975_v4 = vsel %vm938_vm15, %v970_v3, 0 }
 0x25a   : > { %984 = vmatpush.bf16.xpose.msra.mxu2 %v975_v4 }
 0x260   : > { %v1101_v5 = vpop.permute.xlu1 %1100  ;;  %v1099_v6 = vpop.permute.xlu2 %1098 }
 0x261   : > { %v937_v7 = vpop.permute.xlu0 %936  ;;  %2345 = vmatmul.msk.bf16.vlgmr.msra.gmra.mxu2 %vm938_vm15, %v963_v63  ;;  %v1106_v8 = vsel %vm938_vm15, %v1101_v5, 0 }
 0x262   : > { %v943_v9 = vsel %vm938_vm15, %v937_v7, 0 }
 0x263   : > { %952 = vmatpush.bf16.xpose.msra.mxu1 %v943_v9 }
 0x268   : > { %v1251_v10 = vpop.permute.xlu2 %1250 }
 0x269   : > { %v1256_v11 = vsel %vm938_vm15, %v1251_v10, 0 }
 0x26a   : > { %2344 = vmatmul.msk.bf16.vlgmr.msra.gmra.mxu1 %vm938_vm15, %v930_v2 }
 0x26b   : > { %1115 = vmatpush.bf16.xpose.msrb.mxu1 %v1106_v8 }
 0x270   : > { %v1275_v12 = vpop.permute.xlu2 %1274  ;;  %v1125_v13 = vpop.permute.xlu0 %1124 }
 0x271   : > { %v1280_v14 = vsel %vm938_vm15, %v1275_v12, 0  ;;  %v1130_v15 = vsel %vm938_vm15, %v1125_v13, 0 }
 0x272   : > { %v1123_v16 = vpop.permute.xlu1 %1122  ;;  %1139 = vmatpush.bf16.xpose.msrb.mxu2 %v1130_v15 }
 0x273   : > { %1265 = vmatpush.bf16.xpose.msra.mxu1 %v1256_v11 }
 0x278   : > { %v1249_v20 = vpop.permute.xlu0 %1248  ;;  %v1399_v28 = vpop.permute.xlu2 %1398 }
 0x279   : > { %2349 = vmatmul.msk.bf16.vlgmr.msrb.gmra.mxu2 %vm938_vm15, %v1123_v16 }
 0x27a   : > { %1289 = vmatpush.bf16.xpose.msra.mxu2 %v1280_v14  ;;  %2348 = vmatmul.msk.bf16.vlgmr.msrb.gmra.mxu1 %vm938_vm15, %v1099_v6  ;;  %v1401_v17 = vpop.permute.xlu1 %1400 }
 0x27b   : > { %v1406_v19 = vsel %vm938_vm15, %v1401_v17, 0 }
 0x27c   : > { %1415 = vmatpush.bf16.xpose.msrb.mxu1 %v1406_v19 }
 0x280   : > { %v1273_v24 = vpop.permute.xlu0 %1272 }
 0x282   : > { %v1425_v21 = vpop.permute.xlu1 %1424 }
 0x283   : > { %v1430_v22 = vsel %vm938_vm15, %v1425_v21, 0 }
 0x284   : > { %1439 = vmatpush.bf16.xpose.msrb.mxu2 %v1430_v22 }
 0x288   : > { %v1423_v27 = vpop.permute.xlu0 %1422 }
 0x289   : > { %2353 = vmatmul.msk.bf16.vlgmr.msra.gmra.mxu2 %vm938_vm15, %v1273_v24 }
 0x28a   : > { %2352 = vmatmul.msk.bf16.vlgmr.msra.gmra.mxu1 %vm938_vm15, %v1249_v20  ;;  %v1079_v25 = vpop.permute.xlu1 %1078 }
 0x28b   : > { %1091 = vmatpush.bf16.msra.mxu3 %v1079_v25 }
 0x292   : > { %v1204_v26 = vpop.permute.xlu1 %1203 }
 0x293   : > { %1216 = vmatpush.bf16.msrb.mxu3 %v1204_v26 }
 0x299   : > { %2357 = vmatmul.msk.bf16.vlgmr.msrb.gmra.mxu2 %vm938_vm15, %v1423_v27 }
 0x29a   : > { %2356 = vmatmul.msk.bf16.vlgmr.msrb.gmra.mxu1 %vm938_vm15, %v1399_v28  ;;  %v1054_v29 = vpop.permute.xlu1 %1053 }
 0x29b   : > { %1066 = vmatpush.bf16.msrb.mxu0 %v1054_v29 }
 0x2e4   : > { %v986_v35 = vpop.f32.mrf.mxu2 }
 0x2e5   : > { %v3102_v36 = vsel %vm3096_vm0, %v986_v35, -1e+30 }
 0x2e6   : > { %v1006_v37 = vsel %vm999_vm2, %v3102_v36, -inf }
 0x2e7   : > { %v954_v38 = vpop.f32.mrf.mxu1  ;;  %1007 = vmax.xlane.f32.xlu2 %v1006_v37 }
 0x2e8   : > { %v3108_v40 = vsel %vm3096_vm0, %v954_v38, -1e+30 }
 0x2e9   : > { %v1000_v41 = vsel %vm999_vm2, %v3108_v40, -inf }
 0x2ea   : > { %1001 = vmax.xlane.f32.xlu1 %v1000_v41 }
 0x2ec   : > { %v988_v42 = vpop.f32.mrf.mxu2 }
 0x2ed   : > { %v3118_v23 = vsel %vm3112_vm3, %v988_v42, -1e+30 }
 0x2ee   : > { %v1009_v46 = vsel %vm999_vm2, %v3118_v23, -inf }
 0x2ef   : > { %v956_v44 = vpop.f32.mrf.mxu1 }
 0x2f0   : > { %v3122_v45 = vsel %vm3112_vm3, %v956_v44, -1e+30 }
 0x2f1   : > { %v1003_v47 = vsel %vm999_vm2, %v3122_v45, -inf }
 0x2f2   : > { %1010 = vmax.xlane.f32.xlu1 %v1009_v46  ;;  %1004 = vmax.xlane.f32.xlu0 %v1003_v47 }
 0x2f7   : > { %v1117_v48 = vpop.f32.mrf.mxu1 }
 0x2f8   : > { %v3130_v49 = vsel %vm3096_vm0, %v1117_v48, -1e+30 }
 0x2f9   : > { %v1150_v50 = vsel %vm999_vm2, %v3130_v49, -inf }
 0x2fa   : > { %1151 = vmax.xlane.f32.xlu0 %v1150_v50 }
 0x2fc   : > { %v1141_v51 = vpop.f32.mrf.mxu2 }
 0x2fd   : > { %v3136_v52 = vsel %vm3096_vm0, %v1141_v51, -1e+30 }
 0x2fe   : > { %v1156_v56 = vsel %vm999_vm2, %v3136_v52, -inf }
 0x2ff   : > { %v1119_v53 = vpop.f32.mrf.mxu1 }
 0x300   : > { %v3140_v54 = vsel %vm3112_vm3, %v1119_v53, -1e+30 }
 0x301   : > { %v1153_v55 = vsel %vm999_vm2, %v3140_v54, -inf }
 0x302   : > { %1154 = vmax.xlane.f32.xlu2 %v1153_v55  ;;  %1157 = vmax.xlane.f32.xlu0 %v1156_v56 }
 0x304   : > { %v1143_v57 = vpop.f32.mrf.mxu2 }
 0x305   : > { %v3160_v0 = vsel %vm3112_vm3, %v1143_v57, -1e+30 }
 0x306   : > { %v1159_v3 = vsel %vm999_vm2, %v3160_v0, -inf }
 0x307   : > { %v1267_v58 = vpop.f32.mrf.mxu1 }
 0x308   : > { %v3148_v59 = vsel %vm3096_vm0, %v1267_v58, -1e+30 }
 0x309   : > { %v1300_v60 = vsel %vm999_vm2, %v3148_v59, -inf }
 0x30a   : > { %1301 = vmax.xlane.f32.xlu2 %v1300_v60 }
 0x30b   : > { %1353 = vrot.lane.b32.xlu1 %v3064_v43, %s2788_s16 }
 0x30c   : > { %v1291_v62 = vpop.f32.mrf.mxu2 }
 0x30d   : > { %v3156_v63 = vsel %vm3096_vm0, %v1291_v62, -1e+30 }
 0x30e   : > { %v1306_v1 = vsel %vm999_vm2, %v3156_v63, -inf }
 0x30f   : > { %v1269_v2 = vpop.f32.mrf.mxu1  ;;  %1307 = vmax.xlane.f32.xlu0 %v1306_v1 }
 0x310   : > { %v3192_v17 = vsel %vm3112_vm3, %v1269_v2, -1e+30 }
 0x311   : > { %v1303_v19 = vsel %vm999_vm2, %v3192_v17, -inf }
 0x312   : > { %1160 = vmax.xlane.f32.xlu2 %v1159_v3 }
 0x314   : > { %v1293_v4 = vpop.f32.mrf.mxu2 }
 0x315   : > { %v3168_v5 = vsel %vm3112_vm3, %v1293_v4, -1e+30 }
 0x316   : > { %v1309_v7 = vsel %vm999_vm2, %v3168_v5, -inf }
 0x317   : > { %v1417_v6 = vpop.f32.mrf.mxu1 }
 0x318   : > { %v3198_v20 = vsel %vm3096_vm0, %v1417_v6, -1e+30 }
 0x319   : > { %v1450_v21 = vsel %vm999_vm2, %v3198_v20, -inf }
 0x31a   : > { %1310 = vmax.xlane.f32.xlu2 %v1309_v7 }
 0x31c   : > { %v1441_v8 = vpop.f32.mrf.mxu2 }
 0x31d   : > { %v3184_v14 = vsel %vm3096_vm0, %v1441_v8, -1e+30 }
 0x31e   : > { %v1456_v16 = vsel %vm999_vm2, %v3184_v14, -inf }
 0x31f   : > { %v1419_v9 = vpop.f32.mrf.mxu1 }
 0x320   : > { %v3174_v10 = vsel %vm3112_vm3, %v1419_v9, -1e+30 }
 0x321   : > { %v1453_v11 = vsel %vm999_vm2, %v3174_v10, -inf }
 0x322   : > { %1454 = vmax.xlane.f32.xlu0 %v1453_v11 }
 0x324   : > { %v1443_v12 = vpop.f32.mrf.mxu2 }
 0x325   : > { %v3180_v13 = vsel %vm3112_vm3, %v1443_v12, -1e+30 }
 0x326   : > { %v1459_v15 = vsel %vm999_vm2, %v3180_v13, -inf }
 0x327   : > { %1460 = vmax.xlane.f32.xlu2 %v1459_v15 }
 0x32a   : > { %1457 = vmax.xlane.f32.xlu0 %v1456_v16 }
 0x335   : > { %1304 = vmax.xlane.f32.xlu1 %v1303_v19 }
 0x33d   : > { %1451 = vmax.xlane.f32.xlu1 %v1450_v21 }
 0x35a   : > { %v1008_v28 = vpop.xlane.xlu2 %1007 }
 0x35b   : > { %v1014_v35 = vsub.f32 %v3102_v36, %v1008_v28 }
 0x35d   : > { %v1002_v22 = vpop.xlane.xlu1 %1001  ;;  %v1020_v38 = vmul.f32 1.442695, %v1014_v35 }
 0x35e   : > { %v1012_v24 = vsub.f32 %v3108_v40, %v1002_v22 }
 0x360   : > { %v1016_v25 = vmul.f32 1.442695, %v1012_v24 }
 0x362   : > { %2586 = vpow2.f32 %v1016_v25 }
 0x365   : > { %v1011_v26 = vpop.xlane.xlu1 %1010  ;;  %v1005_v27 = vpop.xlane.xlu0 %1004 }
 0x366   : > { %v1015_v29 = vsub.f32 %v3118_v23, %v1011_v26  ;;  %v1013_v30 = vsub.f32 %v3122_v45, %v1005_v27 }
 0x368   : > { %v3205_v31 = vpop.eup %2586  ;;  %v1022_v32 = vmul.f32 1.442695, %v1015_v29  ;;  %v1018_v34 = vmul.f32 1.442695, %v1013_v30 }
 0x369   : > { %v1024_v37 = vsel %vm999_vm2, %v3205_v31, 0.0 }
 0x36a   : > { %2588 = vpow2.f32 %v1022_v32  ;;  %1025 = vadd.xlane.f32.xlu0 %v1024_v37 }
 0x36b   : > { %2590 = vpow2.f32 %v1018_v34 }
 0x36c   : > { %2592 = vpow2.f32 %v1020_v38 }
 0x36d   : > { %v1152_v39 = vpop.xlane.xlu0 %1151 }
 0x36e   : > { %v1162_v40 = vsub.f32 %v3130_v49, %v1152_v39 }
 0x370   : > { %v3211_v41 = vpop.eup %2588  ;;  %v1166_v33 = vmul.f32 1.442695, %v1162_v40 }
 0x371   : > { %v3213_v42 = vpop.eup %2590  ;;  %v1033_v23 = vsel %vm999_vm2, %v3211_v41, 0.0 }
 0x372   : > { %2594 = vpow2.f32 %v1166_v33  ;;  %1034 = vadd.xlane.f32.xlu1 %v1033_v23  ;;  %v1027_v36 = vsel %vm999_vm2, %v3213_v42, 0.0  ;;  %v3220_v46 = vpop.eup %2592 }
 0x373   : > { %1028 = vadd.xlane.f32.xlu2 %v1027_v36  ;;  %v1030_v50 = vsel %vm999_vm2, %v3220_v46, 0.0 }
 0x375   : > { %v1155_v44 = vpop.xlane.xlu2 %1154  ;;  %v1158_v51 = vpop.xlane.xlu0 %1157 }
 0x376   : > { %v1163_v45 = vsub.f32 %v3140_v54, %v1155_v44  ;;  %v1164_v54 = vsub.f32 %v3136_v52, %v1158_v51 }
 0x378   : > { %v3222_v47 = vpop.eup %2594  ;;  %v1168_v48 = vmul.f32 1.442695, %v1163_v45  ;;  %v1170_v60 = vmul.f32 1.442695, %v1164_v54 }
 0x379   : > { %v1174_v49 = vsel %vm999_vm2, %v3222_v47, 0.0 }
 0x37a   : > { %2596 = vpow2.f32 %v1168_v48  ;;  %1175 = vadd.xlane.f32.xlu0 %v1174_v49 }
 0x37b   : > { %1031 = vadd.xlane.f32.xlu2 %v1030_v50 }
 0x37d   : > { %v1302_v53 = vpop.xlane.xlu2 %1301  ;;  %v3246_v3 = vpop.permute.xlu1 %1353 }
 0x37e   : > { %v1312_v55 = vsub.f32 %v3148_v59, %v1302_v53 }
 0x380   : > { %v3229_v56 = vpop.eup %2596  ;;  %v1316_v57 = vmul.f32 1.442695, %v1312_v55 }
 0x381   : > { %v1177_v58 = vsel %vm999_vm2, %v3229_v56, 0.0 }
 0x382   : > { %2598 = vpow2.f32 %v1316_v57  ;;  %v1308_v6 = vpop.xlane.xlu0 %1307 }
 0x383   : > { %1178 = vadd.xlane.f32.xlu2 %v1177_v58  ;;  %2600 = vpow2.f32 %v1170_v60 }
 0x385   : > { %v1161_v2 = vpop.xlane.xlu2 %1160 }
 0x386   : > { %v1165_v11 = vsub.f32 %v3160_v0, %v1161_v2 }
 0x388   : > { %v3234_v62 = vpop.eup %2598  ;;  %v1172_v16 = vmul.f32 1.442695, %v1165_v11 }
 0x389   : > { %v1324_v1 = vsel %vm999_vm2, %v3234_v62, 0.0  ;;  %v3240_v59 = vpop.eup %2600 }
 0x38a   : > { %1325 = vadd.xlane.f32.xlu0 %v1324_v1  ;;  %v1180_v52 = vsel %vm999_vm2, %v3240_v59, 0.0 }
 0x38b   : > { %1228 = vrot.lane.b32.xlu1 %v3068_v61, %s2787_s15  ;;  %s3564_s15 = sld [smem:[#allocation26_spill]] (!%p2416_p1) }
 0x38d   : > { %v1311_v4 = vpop.xlane.xlu2 %1310 }
 0x38e   : > { %v1315_v30 = vsub.f32 %v3168_v5, %v1311_v4 }
 0x390   : > { %v1322_v34 = vmul.f32 1.442695, %v1315_v30 }
 0x392   : > { %1181 = vadd.xlane.f32.xlu0 %v1180_v52 }
 0x393   : > { %1503 = vrot.lane.b32.xlu1 %v3064_v43, %s2789_s21 }
 0x395   : > { %v1455_v21 = vpop.xlane.xlu0 %1454 }
 0x396   : > { %v1463_v25 = vsub.f32 %v3174_v10, %v1455_v21 }
 0x39a   : > { %v1461_v7 = vpop.xlane.xlu2 %1460 }
 0x39b   : > { %v1465_v12 = vsub.f32 %v3180_v13, %v1461_v7  ;;  %v1468_v13 = vmul.f32 1.442695, %v1463_v25 }
 0x39d   : > { %v1472_v19 = vmul.f32 1.442695, %v1465_v12  ;;  %v1458_v35 = vpop.xlane.xlu0 %1457 }
 0x39e   : > { %v1464_v5 = vsub.f32 %v3184_v14, %v1458_v35 }
 0x3a0   : > { %v1470_v33 = vmul.f32 1.442695, %v1464_v5 }
 0x3a8   : > { %v1305_v8 = vpop.xlane.xlu1 %1304 }
 0x3a9   : > { %v1313_v9 = vsub.f32 %v3192_v17, %v1305_v8  ;;  %v1314_v17 = vsub.f32 %v3156_v63, %v1308_v6 }
 0x3ab   : > { %v1318_v15 = vmul.f32 1.442695, %v1313_v9  ;;  %v1320_v28 = vmul.f32 1.442695, %v1314_v17 }
 0x3ad   : > { %2602 = vpow2.f32 %v1318_v15 }
 0x3ae   : > { %2604 = vpow2.f32 %v1172_v16 }
 0x3af   : > { %2606 = vpow2.f32 %v1472_v19 }
 0x3b0   : > { %v1452_v22 = vpop.xlane.xlu1 %1451 }
 0x3b1   : > { %v1462_v43 = vsub.f32 %v3198_v20, %v1452_v22 }
 0x3b3   : > { %v3252_v24 = vpop.eup %2602  ;;  %v1466_v26 = vmul.f32 1.442695, %v1462_v43 }
 0x3b4   : > { %v1327_v0 = vsel %vm999_vm2, %v3252_v24, 0.0  ;;  %v3258_v27 = vpop.eup %2604 }
 0x3b5   : > { %2608 = vpow2.f32 %v1466_v26  ;;  %1328 = vadd.xlane.f32.xlu2 %v1327_v0  ;;  %v3260_v29 = vpop.eup %2606  ;;  %v1183_v10 = vsel %vm999_vm2, %v3258_v27, 0.0 }
 0x3b6   : > { %2610 = vpow2.f32 %v1468_v13  ;;  %v1483_v63 = vsel %vm999_vm2, %v3260_v29, 0.0 }
 0x3b7   : > { %2612 = vpow2.f32 %v1320_v28 }
 0x3b8   : > { %2614 = vpow2.f32 %v1322_v34 }
 0x3b9   : > { %2616 = vpow2.f32 %v1470_v33 }
 0x3bb   : > { %v3262_v20 = vpop.eup %2608 }
 0x3bc   : > { %v1474_v32 = vsel %vm999_vm2, %v3262_v20, 0.0  ;;  %v3271_v37 = vpop.eup %2610 }
 0x3bd   : > { %1484 = vadd.xlane.f32.xlu1 %v1483_v63  ;;  %1184 = vadd.xlane.f32.xlu2 %v1183_v10  ;;  %v3273_v38 = vpop.eup %2612  ;;  %v1477_v39 = vsel %vm999_vm2, %v3271_v37, 0.0 }
 0x3be   : > { %1475 = vadd.xlane.f32.xlu0 %v1474_v32  ;;  %v1330_v40 = vsel %vm999_vm2, %v3273_v38, 0.0  ;;  %v3280_v23 = vpop.eup %2614 }
 0x3bf   : > { %v1333_v36 = vsel %vm999_vm2, %v3280_v23, 0.0  ;;  %v3284_v44 = vpop.eup %2616 }
 0x3c0   : > { %v1480_v14 = vsel %vm999_vm2, %v3284_v44, 0.0 }
 0x3c5   : > { %1478 = vadd.xlane.f32.xlu2 %v1477_v39 }
 0x3c6   : > { %1331 = vadd.xlane.f32.xlu0 %v1330_v40 }
 0x3cd   : > { %1334 = vadd.xlane.f32.xlu2 %v1333_v36 }
 0x3d5   : > { %1481 = vadd.xlane.f32.xlu2 %v1480_v14 }
 0x3da   : > { %1378 = vrot.lane.b32.xlu0 %v3068_v61, %s2788_s16 }
 0x3dd   : > { %v1026_v45 = vpop.xlane.xlu0 %1025 }
 0x3de   : > { %2618 = vrcp.f32 %v1026_v45 }
 0x3e4   : > { %v2619_v50 = vpop.eup %2618 }
 0x3e5   : > { %v1035_v48 = vpop.xlane.xlu1 %1034  ;;  %v1040_v51 = vmul.f32 %v2619_v50, %v3205_v31 }
 0x3e6   : > { %v1029_v49 = vpop.xlane.xlu2 %1028 }
 0x3e7   : > { %2620 = vrcp.f32 %v1029_v49  ;;  %v1044_v55 = vpack.c.bf16 %v1040_v51, %v1040_v51 }
 0x3e8   : > { %2622 = vrcp.f32 %v1035_v48 }
 0x3e9   : > { %v1050_v1 = vunpack.c.l.b16 %v1044_v55 }
 0x3ed   : > { %v2621_v53 = vpop.eup %2620  ;;  %1528 = vrot.lane.b32.xlu2 %v3068_v61, %s2789_s21  ;;  %v1176_v7 = vpop.xlane.xlu0 %1175 }
 0x3ee   : > { %v1041_v54 = vmul.f32 %v2621_v53, %v3213_v42  ;;  %v1032_v57 = vpop.xlane.xlu2 %1031  ;;  %v2623_v58 = vpop.eup %2622 }
 0x3ef   : > { %2624 = vrcp.f32 %v1032_v57  ;;  %v1043_v2 = vmul.f32 %v2623_v58, %v3211_v41 }
 0x3f0   : > { %v1045_v60 = vpack.c.bf16 %v1041_v54, %v1041_v54 }
 0x3f1   : > { %v1047_v61 = vpack.c.bf16 %v1043_v2, %v1043_v2 }
 0x3f2   : > { %v1051_v52 = vunpack.c.l.b16 %v1045_v60 }
 0x3f3   : > { %v1076_v11 = vunpack.c.l.b16 %v1047_v61 }
 0x3f4   : > { %v1052_v4 = vpack.c.b16 %v1051_v52, %v1050_v1 }
 0x3f5   : > { %v2625_v6 = vpop.eup %2624 }
 0x3f6   : > { %v1179_v8 = vpop.xlane.xlu2 %1178  ;;  %2346 = vmatmul.msk.bf16.vlgmr.msrb.gmra.mxu0 %vm999_vm2, %v1052_v4  ;;  %v1042_v31 = vmul.f32 %v2625_v6, %v3220_v46 }
 0x3f7   : > { %2626 = vrcp.f32 %v1179_v8 }
 0x3f8   : > { %v1046_v9 = vpack.c.bf16 %v1042_v31, %v1042_v31  ;;  %2628 = vrcp.f32 %v1176_v7 }
 0x3fa   : > { %v1075_v42 = vunpack.c.l.b16 %v1046_v9 }
 0x3fc   : > { %v1077_v12 = vpack.c.b16 %v1076_v11, %v1075_v42 }
 0x3fd   : > { %v2627_v15 = vpop.eup %2626  ;;  %v1229_v16 = vpop.permute.xlu1 %1228 }
 0x3fe   : > { %2347 = vmatmul.msk.bf16.vlgmr.msra.gmra.mxu3 %vm999_vm2, %v1077_v12  ;;  %1241 = vmatpush.bf16.msra.mxu0 %v1229_v16  ;;  %v2629_v41 = vpop.eup %2628  ;;  %v1191_v19 = vmul.f32 %v2627_v15, %v3229_v56  ;;  %v1326_v0 = vpop.xlane.xlu0 %1325 }
 0x3ff   : > { %1366 = vmatpush.bf16.msra.mxu3 %v3246_v3  ;;  %v1190_v21 = vmul.f32 %v2629_v41, %v3222_v47  ;;  %2630 = vrcp.f32 %v1326_v0 }
 0x400   : > { %v1195_v46 = vpack.c.bf16 %v1191_v19, %v1191_v19 }
 0x401   : > { %v1194_v22 = vpack.c.bf16 %v1190_v21, %v1190_v21 }
 0x402   : > { %v1201_v43 = vunpack.c.l.b16 %v1195_v46 }
 0x403   : > { %v1200_v25 = vunpack.c.l.b16 %v1194_v22 }
 0x405   : > { %v1202_v26 = vpack.c.b16 %v1201_v43, %v1200_v25  ;;  %v1504_v17 = vpop.permute.xlu1 %1503  ;;  %v2631_v28 = vpop.eup %2630 }
 0x406   : > { %v1182_v30 = vpop.xlane.xlu0 %1181  ;;  %v1340_v3 = vmul.f32 %v2631_v28, %v3234_v62 }
 0x408   : > { %v1344_v47 = vpack.c.bf16 %v1340_v3, %v1340_v3 }
 0x40a   : > { %v1350_v5 = vunpack.c.l.b16 %v1344_v47 }
 0x40e   : > { %2350 = vmatmul.msk.bf16.vlgmr.msrb.gmra.mxu3 %vm999_vm2, %v1202_v26 }
 0x40f   : > { %1516 = vmatpush.bf16.msrb.mxu3 %v1504_v17 }
 0x428   : > { %v1329_v13 = vpop.xlane.xlu2 %1328 }
 0x429   : > { %2632 = vrcp.f32 %v1329_v13 }
 0x42a   : > { %2634 = vrcp.f32 %v1182_v30 }
 0x42f   : > { %v2633_v56 = vpop.eup %2632 }
 0x430   : > { %v1341_v63 = vmul.f32 %v2633_v56, %v3252_v24  ;;  %v1185_v10 = vpop.xlane.xlu2 %1184  ;;  %v2635_v34 = vpop.eup %2634 }
 0x431   : > { %v1476_v32 = vpop.xlane.xlu0 %1475  ;;  %2636 = vrcp.f32 %v1185_v10  ;;  %v1192_v40 = vmul.f32 %v2635_v34, %v3240_v59  ;;  %v1485_v31 = vpop.xlane.xlu1 %1484 }
 0x432   : > { %v1345_v35 = vpack.c.bf16 %v1341_v63, %v1341_v63  ;;  %2638 = vrcp.f32 %v1476_v32 }
 0x433   : > { %v1196_v45 = vpack.c.bf16 %v1192_v40, %v1192_v40 }
 0x434   : > { %v1351_v39 = vunpack.c.l.b16 %v1345_v35 }
 0x435   : > { %v1225_v51 = vunpack.c.l.b16 %v1196_v45 }
 0x436   : > { %v1352_v33 = vpack.c.b16 %v1351_v39, %v1350_v5 }
 0x437   : > { %v2637_v36 = vpop.eup %2636 }
 0x438   : > { %v1479_v14 = vpop.xlane.xlu2 %1478  ;;  %2354 = vmatmul.msk.bf16.vlgmr.msra.gmra.mxu3 %vm999_vm2, %v1352_v33  ;;  %v2639_v62 = vpop.eup %2638  ;;  %v1193_v48 = vmul.f32 %v2637_v36, %v3258_v27  ;;  %v2438_v36 = vld [vmem:[%s2981_s25 + $0x8] sm:$0xff] }
 0x439   : > { %2640 = vrcp.f32 %v1479_v14  ;;  %v1332_v24 = vpop.xlane.xlu0 %1331  ;;  %v1490_v50 = vmul.f32 %v2639_v62, %v3262_v20  ;;  %1639 = vmatpush.bf16.msra.mxu1 %v2438_v36  ;;  %v2437_v14 = vld [vmem:[%s2981_s25] sm:$0xff]  ;;  %s3565_s25 = sld [smem:[#allocation24_spill]] (!%p2416_p1) }
 0x43a   : > { %v1197_v49 = vpack.c.bf16 %v1193_v48, %v1193_v48  ;;  %2642 = vrcp.f32 %v1332_v24 }
 0x43b   : > { %v1494_v59 = vpack.c.bf16 %v1490_v50, %v1490_v50 }
 0x43c   : > { %v1226_v53 = vunpack.c.l.b16 %v1197_v49 }
 0x43d   : > { %v1500_v27 = vunpack.c.l.b16 %v1494_v59  ;;  %1640 = vmatpush.bf16.msra.mxu1 %v2437_v14 }
 0x43e   : > { %v1227_v54 = vpack.c.b16 %v1226_v53, %v1225_v51 }
 0x43f   : > { %v2641_v55 = vpop.eup %2640 }
 0x440   : > { %v1491_v57 = vmul.f32 %v2641_v55, %v3271_v37  ;;  %v1335_v58 = vpop.xlane.xlu2 %1334  ;;  %v2643_v60 = vpop.eup %2642  ;;  %2351 = vmatmul.msk.bf16.vlgmr.msra.gmra.mxu0 %vm999_vm2, %v1227_v54 }
 0x441   : > { %2644 = vrcp.f32 %v1335_v58  ;;  %v1342_v2 = vmul.f32 %v2643_v60, %v3273_v38 }
 0x442   : > { %v1495_v1 = vpack.c.bf16 %v1491_v57, %v1491_v57 }
 0x443   : > { %v1346_v20 = vpack.c.bf16 %v1342_v2, %v1342_v2 }
 0x444   : > { %v1501_v52 = vunpack.c.l.b16 %v1495_v1 }
 0x445   : > { %v1375_v61 = vunpack.c.l.b16 %v1346_v20 }
 0x446   : > { %v1502_v4 = vpack.c.b16 %v1501_v52, %v1500_v27 }
 0x447   : > { %v2645_v6 = vpop.eup %2644 }
 0x448   : > { %v1343_v7 = vmul.f32 %v2645_v6, %v3280_v23  ;;  %v1482_v8 = vpop.xlane.xlu2 %1481  ;;  %2358 = vmatmul.msk.bf16.vlgmr.msrb.gmra.mxu3 %vm999_vm2, %v1502_v4 }
 0x449   : > { %2646 = vrcp.f32 %v1482_v8 }
 0x44a   : > { %v1347_v37 = vpack.c.bf16 %v1343_v7, %v1343_v7  ;;  %2648 = vrcp.f32 %v1485_v31 }
 0x44c   : > { %v1376_v9 = vunpack.c.l.b16 %v1347_v37  ;;  %v1379_v42 = vpop.permute.xlu0 %1378 }
 0x44d   : > { %1391 = vmatpush.bf16.msrb.mxu0 %v1379_v42 }
 0x44e   : > { %v1377_v11 = vpack.c.b16 %v1376_v9, %v1375_v61 }
 0x44f   : > { %v2647_v12 = vpop.eup %2646 }
 0x450   : > { %v1529_v15 = vpop.permute.xlu2 %1528  ;;  %2355 = vmatmul.msk.bf16.vlgmr.msrb.gmra.mxu0 %vm999_vm2, %v1377_v11  ;;  %v2649_v38 = vpop.eup %2648  ;;  %v1492_v23 = vmul.f32 %v2647_v12, %v3284_v44 }
 0x451   : > { %1541 = vmatpush.bf16.msra.mxu0 %v1529_v15  ;;  %v1493_v16 = vmul.f32 %v2649_v38, %v3260_v29 }
 0x452   : > { %v1496_v41 = vpack.c.bf16 %v1492_v23, %v1492_v23  ;;  %v2571_v23 = vld [vmem:[%s3560_s27] ss:$0 sm:$0xff] }
 0x453   : > { %v1497_v19 = vpack.c.bf16 %v1493_v16, %v1493_v16 }
 0x454   : > { %v1525_v21 = vunpack.c.l.b16 %v1496_v41  ;;  %v2674_v41 = vld [vmem:[#allocation2] sm:$0xff] }
 0x455   : > { %v1526_v46 = vunpack.c.l.b16 %v1497_v19 }
 0x457   : > { %v1527_v22 = vpack.c.b16 %v1526_v46, %v1525_v21 }
 0x460   : > { %2359 = vmatmul.msk.bf16.vlgmr.msra.gmra.mxu0 %vm999_vm2, %v1527_v22 }
 0x473   : > { %v1068_v13 = vpop.f32.mrf.mxu0 }
 0x47b   : > { %v1070_v28 = vpop.f32.mrf.mxu0 }
 0x481   : > { %v1093_v43 = vpop.f32.mrf.mxu3 }
 0x489   : > { %v1095_v25 = vpop.f32.mrf.mxu3 }
 0x491   : > { %v1218_v26 = vpop.f32.mrf.mxu3 }
 0x499   : > { %v1220_v17 = vpop.f32.mrf.mxu3 }
 0x49a   : > { %v2538_v0 = vpack.i.bf16 %v1220_v17, %v1218_v26 }
 0x49c   : > { %2539 = vrot.lane.b32.xlu0 %v2538_v0, %s2790_s26 }
 0x4bb   : > { %v1368_v30 = vpop.f32.mrf.mxu3 }
 0x4bd   : > { %v1243_v44 = vpop.f32.mrf.mxu0 }
 0x4c3   : > { %v1370_v3 = vpop.f32.mrf.mxu3 }
 0x4c4   : > { %v2543_v29 = vpack.i.bf16 %v1370_v3, %v1368_v30 }
 0x4c5   : > { %v1245_v56 = vpop.f32.mrf.mxu0 }
 0x4c6   : > { %2544 = vrot.lane.b32.xlu0 %v2543_v29, %s2791_s30  ;;  %v2553_v63 = vpack.i.bf16 %v1245_v56, %v1243_v44  ;;  %v2677_v29 = vld [vmem:[#allocation2 + $0x18] sm:$0xff] }
 0x4cb   : > { %v1518_v47 = vpop.f32.mrf.mxu3 }
 0x4cd   : > { %v1393_v10 = vpop.f32.mrf.mxu0 }
 0x4ce   : > { %2554 = vrot.lane.b32.xlu0 %v2553_v63, %s2790_s26 }
 0x4d3   : > { %v1520_v32 = vpop.f32.mrf.mxu3 }
 0x4d4   : > { %v2548_v34 = vpack.i.bf16 %v1520_v32, %v1518_v47 }
 0x4d5   : > { %v1395_v35 = vpop.f32.mrf.mxu0 }
 0x4d6   : > { %2549 = vrot.lane.b32.xlu2 %v2548_v34, %s2792_s24  ;;  %v2558_v5 = vpack.i.bf16 %v1395_v35, %v1393_v10 }
 0x4dd   : > { %v1543_v39 = vpop.f32.mrf.mxu0 }
 0x4de   : > { %2559 = vrot.lane.b32.xlu2 %v2558_v5, %s2791_s30 }
 0x4e5   : > { %v1545_v40 = vpop.f32.mrf.mxu0 }
 0x4e6   : > { %v2563_v33 = vpack.i.bf16 %v1545_v40, %v1543_v39 }
 0x4e8   : > { %2564 = vrot.lane.b32.xlu0 %v2563_v33, %s2792_s24 }
 0x50e   : > { %v2540_v62 = vpop.permute.xlu0 %2539 }
 0x50f   : > { %v2542_v45 = vunpack.i.h.bf16 %v2540_v62  ;;  %v2541_v48 = vunpack.i.l.bf16 %v2540_v62 }
 0x511   : > { %v1597_v53 = vsel %vm938_vm15, %v1070_v28, %v2542_v45  ;;  %v1596_v55 = vsel %vm938_vm15, %v1068_v13, %v2541_v48  ;;  %v2676_v13 = vld [vmem:[#allocation2 + $0x10] sm:$0xff] }
 0x530   : > { %v2550_v24 = vpop.permute.xlu2 %2549 }
 0x531   : > { %v2552_v54 = vunpack.i.h.bf16 %v2550_v24  ;;  %v2551_v59 = vunpack.i.l.bf16 %v2550_v24 }
 0x538   : > { %v2545_v49 = vpop.permute.xlu0 %2544  ;;  %v2560_v6 = vpop.permute.xlu2 %2559 }
 0x539   : > { %v2547_v50 = vunpack.i.h.bf16 %v2545_v49  ;;  %v2546_v51 = vunpack.i.l.bf16 %v2545_v49  ;;  %v2562_v8 = vunpack.i.h.bf16 %v2560_v6  ;;  %v2561_v31 = vunpack.i.l.bf16 %v2560_v6 }
 0x53b   : > { %v1600_v57 = vsel %vm999_vm2, %v1596_v55, %v2546_v51  ;;  %v1601_v58 = vsel %vm999_vm2, %v1597_v53, %v2547_v50 }
 0x53c   : > { %v1605_v60 = vsel %vm1604_vm4, %v1600_v57, %v2551_v59  ;;  %v1606_v1 = vsel %vm1604_vm4, %v1601_v58, %v2552_v54  ;;  %v2440_v57 = vld [vmem:[%s2998_s19 + $0x8] sm:$0xff] }
 0x53d   : > { %v1613_v27 = vpack.c.bf16 %v1606_v1, %v1605_v60  ;;  %1802 = vmatpush.bf16.msra.mxu2 %v2440_v57  ;;  %v2439_v1 = vld [vmem:[%s2998_s19] sm:$0xff]  ;;  %v2448_v57 = vld [vmem:[%s3012_s7 + $0x38] sm:$0xff]  ;;  %s3566_s19 = sld [smem:[#allocation25_spill]] (!%p2416_p1) }
 0x53e   : > { %1965 = vmatpush.bf16.msra.mxu3 %v2448_v57 }
 0x53f   : > { %2368 = vmatmul.msk.bf16.vlgmr.msra.gmra.mxu1 %vm750_vm1, %v1613_v27 }
 0x540   : > { %v2555_v52 = vpop.permute.xlu0 %2554 }
 0x541   : > { %v2557_v2 = vunpack.i.h.bf16 %v2555_v52  ;;  %v2556_v4 = vunpack.i.l.bf16 %v2555_v52  ;;  %1803 = vmatpush.bf16.msra.mxu2 %v2439_v1  ;;  %v2444_v1 = vld [vmem:[%s3012_s7 + $0x18] sm:$0xff] }
 0x543   : > { %v1599_v20 = vsel %vm938_vm15, %v1095_v25, %v2557_v2  ;;  %v1598_v7 = vsel %vm938_vm15, %v1093_v43, %v2556_v4  ;;  %v2675_v43 = vld [vmem:[#allocation2 + $0x8] sm:$0xff] }
 0x544   : > { %v1602_v42 = vsel %vm999_vm2, %v1598_v7, %v2561_v31  ;;  %v1603_v11 = vsel %vm999_vm2, %v1599_v20, %v2562_v8 }
 0x55a   : > { %v2565_v37 = vpop.permute.xlu0 %2564 }
 0x55b   : > { %v2567_v61 = vunpack.i.h.bf16 %v2565_v37  ;;  %v2566_v9 = vunpack.i.l.bf16 %v2565_v37 }
 0x55d   : > { %v1607_v12 = vsel %vm1604_vm4, %v1602_v42, %v2566_v9  ;;  %v1608_v15 = vsel %vm1604_vm4, %v1603_v11, %v2567_v61 }
 0x55e   : > { %v1614_v38 = vpack.c.bf16 %v1608_v15, %v1607_v12  ;;  %v2572_v15 = vld [vmem:[%s3562_s18] ss:$0 sm:$0xff] }
 0x560   : > { %2369 = vmatmul.msk.bf16.gmra.mxu1 %vm750_vm1, %v1614_v38 }
 0x5bc   : > { %v1642_v16 = vpop.f32.mrf.mxu1 }
 0x5bd   : > { %v1652_v19 = vadd.f32 %v2674_v41, %v1642_v16  ;;  %v2573_v41 = vld [vmem:[%s712_s28] ss:$0 sm:$0xff] }
 0x5bf   : > { %v3340_v21 = vadd.f32 %v2571_v23, %v1652_v19 }
 0x5c1   : > { %v1666_v46 = vsel %vm750_vm1, %v3340_v21, 0.0 }
 0x5c2   : > { %1667 = vadd.xlane.f32.xlu1 %v1666_v46 }
 0x5c4   : > { %v1644_v22 = vpop.f32.mrf.mxu1 }
 0x5c5   : > { %v1653_v25 = vadd.f32 %v2675_v43, %v1644_v22 }
 0x5c7   : > { %v3344_v26 = vadd.f32 %v2571_v23, %v1653_v25 }
 0x5c9   : > { %v1669_v17 = vsel %vm750_vm1, %v3344_v26, 0.0 }
 0x5ca   : > { %1670 = vadd.xlane.f32.xlu2 %v1669_v17 }
 0x5dd   : > { %v1647_v0 = vpop.f32.mrf.mxu1 }
 0x5de   : > { %v1654_v28 = vadd.f32 %v2676_v13, %v1647_v0 }
 0x5e0   : > { %v3348_v30 = vadd.f32 %v2571_v23, %v1654_v28 }
 0x5e2   : > { %v1672_v44 = vsel %vm750_vm1, %v3348_v30, 0.0 }
 0x5e3   : > { %1673 = vadd.xlane.f32.xlu0 %v1672_v44 }
 0x5e5   : > { %v1649_v3 = vpop.f32.mrf.mxu1 }
 0x5e6   : > { %v1655_v56 = vadd.f32 %v2677_v29, %v1649_v3 }
 0x5e8   : > { %v3352_v47 = vadd.f32 %v2571_v23, %v1655_v56 }
 0x5ea   : > { %v1675_v63 = vsel %vm750_vm1, %v3352_v47, 0.0 }
 0x5eb   : > { %1676 = vadd.xlane.f32.xlu1 %v1675_v63 }
 0x635   : > { %v1668_v10 = vpop.xlane.xlu1 %1667 }
 0x636   : > { %v1678_v32 = vmul.f32 %v1668_v10, %v3021_v18 }
 0x638   : > { %v1682_v34 = vsub.f32 %v3340_v21, %v1678_v32 }
 0x63a   : > { %v1686_v35 = vmul.f32 %v1682_v34, %v1682_v34 }
 0x63c   : > { %v1690_v5 = vsel %vm750_vm1, %v1686_v35, 0.0 }
 0x63d   : > { %v1671_v39 = vpop.xlane.xlu2 %1670  ;;  %1691 = vadd.xlane.f32.xlu1 %v1690_v5 }
 0x63e   : > { %v1679_v40 = vmul.f32 %v1671_v39, %v3021_v18 }
 0x640   : > { %v1683_v33 = vsub.f32 %v3344_v26, %v1679_v40 }
 0x642   : > { %v1687_v36 = vmul.f32 %v1683_v33, %v1683_v33 }
 0x644   : > { %v1693_v14 = vsel %vm750_vm1, %v1687_v36, 0.0 }
 0x645   : > { %1694 = vadd.xlane.f32.xlu1 %v1693_v14 }
 0x656   : > { %v1674_v62 = vpop.xlane.xlu0 %1673 }
 0x657   : > { %v1680_v45 = vmul.f32 %v1674_v62, %v3021_v18 }
 0x659   : > { %v3364_v48 = vsub.f32 %v3348_v30, %v1680_v45 }
 0x65b   : > { %v1688_v24 = vmul.f32 %v3364_v48, %v3364_v48 }
 0x65d   : > { %v1696_v49 = vsel %vm750_vm1, %v1688_v24, 0.0 }
 0x65e   : > { %1697 = vadd.xlane.f32.xlu1 %v1696_v49  ;;  %v1677_v50 = vpop.xlane.xlu1 %1676 }
 0x65f   : > { %v1681_v51 = vmul.f32 %v1677_v50, %v3021_v18 }
 0x661   : > { %v3371_v53 = vsub.f32 %v3352_v47, %v1681_v51 }
 0x663   : > { %v1689_v55 = vmul.f32 %v3371_v53, %v3371_v53 }
 0x665   : > { %v1699_v54 = vsel %vm750_vm1, %v1689_v55, 0.0 }
 0x666   : > { %1700 = vadd.xlane.f32.xlu1 %v1699_v54 }
 0x6b0   : > { %v1692_v59 = vpop.xlane.xlu1 %1691 }
 0x6b1   : > { %v1702_v58 = vmul.f32 %v1692_v59, %v3021_v18 }
 0x6b3   : > { %v1706_v60 = vadd.f32 1e-05, %v1702_v58  ;;  %v2446_v58 = vld [vmem:[%s3012_s7 + $0x28] sm:$0xff] }
 0x6b5   : > { %2650 = vrsqrt.f32 %v1706_v60  ;;  %vm1716_vm6 = vweird.f32 %v1706_v60 }
 0x6b8   : > { %v1695_v27 = vpop.xlane.xlu1 %1694 }
 0x6b9   : > { %v1703_v52 = vmul.f32 %v1695_v27, %v3021_v18 }
 0x6bb   : > { %v2651_v2 = vpop.eup %2650  ;;  %v1707_v4 = vadd.f32 1e-05, %v1703_v52 }
 0x6bc   : > { %v1711_v6 = vmul.f32 %v2651_v2, %v1706_v60  ;;  %vm1717_vm5 = vweird.f32 %v2651_v2  ;;  %v2445_v60 = vld [vmem:[%s3012_s7 + $0x20] sm:$0xff] }
 0x6bd   : > { %2652 = vrsqrt.f32 %v1707_v4  ;;  %vm1718_vm7 = vmor %vm1716_vm6, %vm1717_vm5  ;;  %vm1726_vm9 = vweird.f32 %v1707_v4 }
 0x6be   : > { %v1712_v20 = vmul.f32 %v2651_v2, %v1711_v6 }
 0x6c0   : > { %v1713_v7 = vmul.f32 0.5, %v1712_v20  ;;  %v2442_v20 = vld [vmem:[%s3012_s7 + $0x8] sm:$0xff] }
 0x6c2   : > { %v1714_v8 = vsub.f32 1.5, %v1713_v7 }
 0x6c3   : > { %v2653_v31 = vpop.eup %2652 }
 0x6c4   : > { %v1715_v37 = vmul.f32 %v2651_v2, %v1714_v8  ;;  %v1721_v61 = vmul.f32 %v2653_v31, %v1707_v4  ;;  %vm1727_vm8 = vweird.f32 %v2653_v31 }
 0x6c5   : > { %vm1728_vm10 = vmor %vm1726_vm9, %vm1727_vm8 }
 0x6c6   : > { %v1722_v9 = vmul.f32 %v2653_v31, %v1721_v61  ;;  %v1719_v42 = vsel %vm1718_vm7, %v2651_v2, %v1715_v37  ;;  %v2443_v2 = vld [vmem:[%s3012_s7 + $0x10] sm:$0xff] }
 0x6c7   : > { %v1750_v38 = vmul.f32 %v1719_v42, %v1682_v34 }
 0x6c8   : > { %v1723_v11 = vmul.f32 0.5, %v1722_v9 }
 0x6c9   : > { %v1757_v19 = vmul.f32 %v2572_v15, %v1750_v38 }
 0x6ca   : > { %v1724_v12 = vsub.f32 1.5, %v1723_v11 }
 0x6cb   : > { %v1764_v25 = vadd.f32 %v2573_v41, %v1757_v19 }
 0x6cc   : > { %v1725_v23 = vmul.f32 %v2653_v31, %v1724_v12 }
 0x6ce   : > { %v1729_v16 = vsel %vm1728_vm10, %v2653_v31, %v1725_v23  ;;  %v2441_v31 = vld [vmem:[%s3012_s7] sm:$0xff] }
 0x6cf   : > { %v1751_v46 = vmul.f32 %v1729_v16, %v1683_v33 }
 0x6d1   : > { %v1758_v22 = vmul.f32 %v2572_v15, %v1751_v46  ;;  %v1698_v43 = vpop.xlane.xlu1 %1697 }
 0x6d2   : > { %v1704_v0 = vmul.f32 %v1698_v43, %v3021_v18 }
 0x6d3   : > { %v1765_v17 = vadd.f32 %v2573_v41, %v1758_v22 }
 0x6d4   : > { %v1708_v13 = vadd.f32 1e-05, %v1704_v0 }
 0x6d5   : > { %v1772_v28 = vpack.c.bf16 %v1765_v17, %v1764_v25 }
 0x6d6   : > { %2654 = vrsqrt.f32 %v1708_v13  ;;  %vm1736_vm12 = vweird.f32 %v1708_v13 }
 0x6d7   : > { %2378 = vmatmul.msk.bf16.vlgmr.msra.gmra.mxu2 %vm750_vm1, %v1772_v28 }
 0x6d9   : > { %v1701_v44 = vpop.xlane.xlu1 %1700 }
 0x6da   : > { %v1705_v3 = vmul.f32 %v1701_v44, %v3021_v18 }
 0x6dc   : > { %v2655_v29 = vpop.eup %2654  ;;  %v1709_v56 = vadd.f32 1e-05, %v1705_v3 }
 0x6dd   : > { %v1731_v63 = vmul.f32 %v2655_v29, %v1708_v13  ;;  %vm1737_vm11 = vweird.f32 %v2655_v29 }
 0x6de   : > { %2656 = vrsqrt.f32 %v1709_v56  ;;  %vm1738_vm13 = vmor %vm1736_vm12, %vm1737_vm11  ;;  %vm1746_vm15 = vweird.f32 %v1709_v56 }
 0x6df   : > { %v1732_v10 = vmul.f32 %v2655_v29, %v1731_v63 }
 0x6e1   : > { %v1733_v32 = vmul.f32 0.5, %v1732_v10 }
 0x6e3   : > { %v1734_v34 = vsub.f32 1.5, %v1733_v32 }
 0x6e4   : > { %v2657_v35 = vpop.eup %2656 }
 0x6e5   : > { %v1735_v5 = vmul.f32 %v2655_v29, %v1734_v34  ;;  %v1741_v39 = vmul.f32 %v2657_v35, %v1709_v56  ;;  %vm1747_vm14 = vweird.f32 %v2657_v35 }
 0x6e6   : > { %vm1748_vm0 = vmor %vm1746_vm15, %vm1747_vm14 }
 0x6e7   : > { %v1742_v40 = vmul.f32 %v2657_v35, %v1741_v39  ;;  %v1739_v33 = vsel %vm1738_vm13, %v2655_v29, %v1735_v5 }
 0x6e8   : > { %v1752_v62 = vmul.f32 %v1739_v33, %v3364_v48  ;;  %v2447_v48 = vld [vmem:[%s3012_s7 + $0x30] sm:$0xff] }
 0x6e9   : > { %v1743_v36 = vmul.f32 0.5, %v1742_v40  ;;  %1966 = vmatpush.bf16.msra.mxu3 %v2447_v48 }
 0x6ea   : > { %v1759_v50 = vmul.f32 %v2572_v15, %v1752_v62 }
 0x6eb   : > { %v1744_v14 = vsub.f32 1.5, %v1743_v36 }
 0x6ec   : > { %v1766_v55 = vadd.f32 %v2573_v41, %v1759_v50 }
 0x6ed   : > { %v1745_v45 = vmul.f32 %v2657_v35, %v1744_v14  ;;  %1967 = vmatpush.bf16.msra.mxu3 %v2446_v58 }
 0x6ef   : > { %v1749_v24 = vsel %vm1748_vm0, %v2657_v35, %v1745_v45 }
 0x6f0   : > { %v1753_v49 = vmul.f32 %v1749_v24, %v3371_v53  ;;  %v2574_v53 = vld [vmem:[%s720_s11] ss:$0 sm:$0xff] }
 0x6f1   : > { %1968 = vmatpush.bf16.msra.mxu3 %v2445_v60 }
 0x6f2   : > { %v1760_v51 = vmul.f32 %v2572_v15, %v1753_v49 }
 0x6f4   : > { %v1767_v54 = vadd.f32 %v2573_v41, %v1760_v51 }
 0x6f5   : > { %1969 = vmatpush.bf16.msra.mxu3 %v2444_v1 }
 0x6f6   : > { %v1773_v59 = vpack.c.bf16 %v1767_v54, %v1766_v55 }
 0x6f8   : > { %2379 = vmatmul.msk.bf16.gmra.mxu2 %vm750_vm1, %v1773_v59 }
 0x6f9   : > { %1970 = vmatpush.bf16.msra.mxu3 %v2443_v2 }
 0x6fd   : > { %1971 = vmatpush.bf16.msra.mxu3 %v2442_v20 }
 0x701   : > { %1972 = vmatpush.bf16.msra.mxu3 %v2441_v31 }
 0x75a   : > { %v1805_v27 = vpop.f32.mrf.mxu2 }
 0x75b   : > { %v1806_v52 = vadd.f32 %v2574_v53, %v1805_v27 }
 0x75d   : > { %v2380_v4 = vmul.f32 -1.702, %v1806_v52 }
 0x75f   : > { %v1823_v6 = vmul.f32 1.442695, %v2380_v4 }
 0x761   : > { %2658 = vpow2.f32 %v1823_v6 }
 0x762   : > { %v1807_v7 = vpop.f32.mrf.mxu2 }
 0x763   : > { %v1808_v8 = vadd.f32 %v2574_v53, %v1807_v7 }
 0x765   : > { %v2381_v37 = vmul.f32 -1.702, %v1808_v8 }
 0x767   : > { %v2659_v61 = vpop.eup %2658  ;;  %v1825_v9 = vmul.f32 1.442695, %v2381_v37 }
 0x768   : > { %v1831_v42 = vadd.f32 1.0, %v2659_v61 }
 0x769   : > { %2660 = vpow2.f32 %v1825_v9 }
 0x76a   : > { %2662 = vrcp.f32 %v1831_v42  ;;  %v1846_v22 = vand.u32 2147483648, %v1831_v42  ;;  %vm1840_vm3 = vweird.f32 %v1831_v42  ;;  %v1844_v43 = vand.u32 2147483647, %v1831_v42 }
 0x76c   : > { %v1847_v29 = vor.u32 1.1754944e-38, %v1846_v22  ;;  %vm1845_vm6 = vcmp.eq.f32.partialorder %v1844_v43, 8.507059e+37 }
 0x76f   : > { %v2661_v11 = vpop.eup %2660 }
 0x770   : > { %v2663_v12 = vpop.eup %2662  ;;  %v1832_v15 = vadd.f32 1.0, %v2661_v11 }
 0x771   : > { %v1836_v38 = vmul.f32 %v2663_v12, %v1831_v42  ;;  %vm1841_vm2 = vweird.f32 %v2663_v12 }
 0x772   : > { %2664 = vrcp.f32 %v1832_v15  ;;  %vm1842_vm4 = vmor %vm1840_vm3, %vm1841_vm2  ;;  %v1859_v17 = vand.u32 2147483647, %v1832_v15  ;;  %v1861_v0 = vand.u32 2147483648, %v1832_v15  ;;  %vm1855_vm7 = vweird.f32 %v1832_v15 }
 0x773   : > { %v1837_v23 = vsub.f32 1.0, %v1836_v38 }
 0x774   : > { %v1862_v32 = vor.u32 1.1754944e-38, %v1861_v0  ;;  %vm1860_vm9 = vcmp.eq.f32.partialorder %v1859_v17, 8.507059e+37 }
 0x775   : > { %v1838_v16 = vmul.f32 %v2663_v12, %v1837_v23 }
 0x777   : > { %v1839_v19 = vadd.f32 %v2663_v12, %v1838_v16 }
 0x778   : > { %v2665_v41 = vpop.eup %2664 }
 0x779   : > { %v1851_v46 = vmul.f32 %v2665_v41, %v1832_v15  ;;  %v1843_v28 = vsel %vm1842_vm4, %v2663_v12, %v1839_v19  ;;  %vm1856_vm5 = vweird.f32 %v2665_v41  ;;  %v2575_v12 = vld [vmem:[%s728_s22] ss:$0 sm:$0xff] }
 0x77a   : > { %v1848_v10 = vsel %vm1845_vm6, %v1847_v29, %v1843_v28  ;;  %vm1857_vm8 = vmor %vm1855_vm7, %vm1856_vm5 }
 0x77b   : > { %v1852_v25 = vsub.f32 1.0, %v1851_v46  ;;  %v1810_v13 = vpop.f32.mrf.mxu2  ;;  %v1895_v39 = vmul.f32 %v1848_v10, %v1806_v52 }
 0x77c   : > { %v1811_v3 = vadd.f32 %v2574_v53, %v1810_v13 }
 0x77d   : > { %v1853_v44 = vmul.f32 %v2665_v41, %v1852_v25 }
 0x77e   : > { %v2382_v63 = vmul.f32 -1.702, %v1811_v3 }
 0x77f   : > { %v1854_v56 = vadd.f32 %v2665_v41, %v1853_v44 }
 0x780   : > { %v1827_v35 = vmul.f32 1.442695, %v2382_v63 }
 0x781   : > { %v1858_v34 = vsel %vm1857_vm8, %v2665_v41, %v1854_v56 }
 0x782   : > { %v1863_v5 = vsel %vm1860_vm9, %v1862_v32, %v1858_v34  ;;  %2666 = vpow2.f32 %v1827_v35 }
 0x783   : > { %v1896_v40 = vmul.f32 %v1863_v5, %v1808_v8  ;;  %v1812_v33 = vpop.f32.mrf.mxu2 }
 0x784   : > { %v1813_v14 = vadd.f32 %v2574_v53, %v1812_v33 }
 0x785   : > { %v1915_v36 = vpack.c.bf16 %v1896_v40, %v1895_v39 }
 0x786   : > { %v2383_v62 = vmul.f32 -1.702, %v1813_v14 }
 0x787   : > { %1973 = vmatmul.bf16.vlgmr.msra.gmra.mxu3 %v1915_v36 }
 0x788   : > { %v2667_v45 = vpop.eup %2666  ;;  %v1829_v24 = vmul.f32 1.442695, %v2383_v62 }
 0x789   : > { %v1833_v49 = vadd.f32 1.0, %v2667_v45 }
 0x78a   : > { %2668 = vpow2.f32 %v1829_v24 }
 0x78b   : > { %2670 = vrcp.f32 %v1833_v49  ;;  %v1876_v1 = vand.u32 2147483648, %v1833_v49  ;;  %vm1870_vm11 = vweird.f32 %v1833_v49  ;;  %v1874_v53 = vand.u32 2147483647, %v1833_v49 }
 0x78d   : > { %v1877_v20 = vor.u32 1.1754944e-38, %v1876_v1  ;;  %vm1875_vm14 = vcmp.eq.f32.partialorder %v1874_v53, 8.507059e+37 }
 0x790   : > { %v2669_v50 = vpop.eup %2668 }
 0x791   : > { %v2671_v51 = vpop.eup %2670  ;;  %v1834_v55 = vadd.f32 1.0, %v2669_v50 }
 0x792   : > { %v1866_v54 = vmul.f32 %v2671_v51, %v1833_v49  ;;  %vm1871_vm10 = vweird.f32 %v2671_v51 }
 0x793   : > { %2672 = vrcp.f32 %v1834_v55  ;;  %vm1872_vm12 = vmor %vm1870_vm11, %vm1871_vm10  ;;  %v1891_v52 = vand.u32 2147483648, %v1834_v55  ;;  %v1889_v6 = vand.u32 2147483647, %v1834_v55  ;;  %vm1885_vm15 = vweird.f32 %v1834_v55 }
 0x794   : > { %v1867_v59 = vsub.f32 1.0, %v1866_v54 }
 0x795   : > { %v1892_v31 = vor.u32 1.1754944e-38, %v1891_v52  ;;  %vm1890_vm2 = vcmp.eq.f32.partialorder %v1889_v6, 8.507059e+37 }
 0x796   : > { %v1868_v57 = vmul.f32 %v2671_v51, %v1867_v59 }
 0x798   : > { %v1869_v58 = vadd.f32 %v2671_v51, %v1868_v57 }
 0x799   : > { %v2673_v48 = vpop.eup %2672 }
 0x79a   : > { %v1881_v60 = vmul.f32 %v2673_v48, %v1834_v55  ;;  %v1873_v2 = vsel %vm1872_vm12, %v2671_v51, %v1869_v58  ;;  %vm1886_vm13 = vweird.f32 %v2673_v48 }
 0x79b   : > { %v1878_v8 = vsel %vm1875_vm14, %v1877_v20, %v1873_v2  ;;  %vm1887_vm0 = vmor %vm1885_vm15, %vm1886_vm13 }
 0x79c   : > { %v1882_v27 = vsub.f32 1.0, %v1881_v60  ;;  %v1897_v9 = vmul.f32 %v1878_v8, %v1811_v3 }
 0x79e   : > { %v1883_v4 = vmul.f32 %v2673_v48, %v1882_v27 }
 0x7a0   : > { %v1884_v7 = vadd.f32 %v2673_v48, %v1883_v4 }
 0x7a2   : > { %v1888_v37 = vsel %vm1887_vm0, %v2673_v48, %v1884_v7 }
 0x7a3   : > { %v1893_v61 = vsel %vm1890_vm2, %v1892_v31, %v1888_v37 }
 0x7a4   : > { %v1898_v42 = vmul.f32 %v1893_v61, %v1813_v14 }
 0x7a6   : > { %v1916_v11 = vpack.c.bf16 %v1898_v42, %v1897_v9 }
 0x7a8   : > { %1978 = vmatmul.bf16.gmra.mxu3 %v1916_v11 }
 0x80a   : > { %v1974_v15 = vpop.f32.mrf.mxu3 }
 0x80b   : > { %v1984_v38 = vadd.f32 %v1974_v15, %v3340_v21 }
 0x80d   : > { %v1992_v23 = vadd.f32 %v2575_v12, %v1984_v38 }
 0x80f   : > { %1996 = vst.msk [vmem:[#allocation2] sm:$0xff] %vm750_vm1, %v1992_v23 }
 0x812   : > { %v1976_v16 = vpop.f32.mrf.mxu3 }
 0x813   : > { %v1985_v41 = vadd.f32 %v1976_v16, %v3344_v26 }
 0x815   : > { %v1993_v19 = vadd.f32 %v2575_v12, %v1985_v41 }
 0x817   : > { %1997 = vst.msk [vmem:[#allocation2 + $0x8] sm:$0xff] %vm750_vm1, %v1993_v19 }
 0x82b   : > { %v1979_v46 = vpop.f32.mrf.mxu3 }
 0x82c   : > { %v1986_v22 = vadd.f32 %v1979_v46, %v3348_v30 }
 0x82e   : > { %v1994_v43 = vadd.f32 %v2575_v12, %v1986_v22 }
 0x830   : > { %1998 = vst.msk [vmem:[#allocation2 + $0x10] sm:$0xff] %vm750_vm1, %v1994_v43 }
 0x833   : > { %v1981_v25 = vpop.f32.mrf.mxu3 }
 0x834   : > { %v1987_v17 = vadd.f32 %v1981_v25, %v3352_v47  ;;  %2003 = sbr.rel (%p2416_p1) target bundleno = 2526 (0x9de), region = 92 }
 0x836   : > { %v1995_v0 = vadd.f32 %v2575_v12, %v1987_v17 }
 0x838   : > { %1999 = vst.msk [vmem:[#allocation2 + $0x18] sm:$0xff] %vm750_vm1, %v1995_v0 }
 0x839   : > { %v2008_v21 = vrot.slane %v1994_v43, 7  ;;  %vm2009_vm3 = vcmask 1041409   ;;  %vm2012_vm4 = vcmask 254976   ;;  %v2450_v34 = vld [vmem:[%s3564_s15 + $0x8] sm:$0xff]  ;;  %v2449_v35 = vld [vmem:[%s3564_s15] sm:$0xff]  ;;  %vm2105_vm8 = vcmask 253952  }
 0x83a   : > { %2095 = vmatpush.bf16.msra.mxu0 %v2450_v34  ;;  %v2678_v49 = vld [vmem:[%s3565_s25] ss:$0 sm:$0xff] }
 0x83b   : > { %v2010_v26 = vsel %vm2009_vm3, %v2008_v21, %v1992_v23 }
 0x83c   : > { %v2013_v13 = vsel %vm2012_vm4, %v2010_v26, 0.0 }
 0x83d   : > { %2014 = vadd.xlane.f32.xlu0 %v2013_v13 }
 0x83e   : > { %2096 = vmatpush.bf16.msra.mxu0 %v2449_v35 }
 0x8b0   : > { %v2015_v30 = vpop.xlane.xlu0 %2014 }
 0x8b1   : > { %v2016_v28 = vmul.f32 %v2015_v30, %v3021_v18 }
 0x8b3   : > { %v2018_v44 = vrot.slane %v2016_v28, 1  ;;  %v2021_v3 = vsub.f32 %v1992_v23, %v2016_v28 }
 0x8b5   : > { %v2022_v29 = vsub.f32 %v1994_v43, %v2018_v44  ;;  %v2023_v56 = vmul.f32 %v2021_v3, %v2021_v3 }
 0x8b7   : > { %v2024_v47 = vmul.f32 %v2022_v29, %v2022_v29 }
 0x8b9   : > { %v2027_v63 = vrot.slane %v2024_v47, 7 }
 0x8bb   : > { %v2028_v10 = vsel %vm2009_vm3, %v2027_v63, %v2023_v56 }
 0x8bc   : > { %v2030_v32 = vsel %vm2012_vm4, %v2028_v10, 0.0 }
 0x8bd   : > { %2031 = vadd.xlane.f32.xlu0 %v2030_v32 }
 0x930   : > { %v2032_v5 = vpop.xlane.xlu0 %2031 }
 0x931   : > { %v2033_v39 = vmul.f32 %v2032_v5, %v3021_v18  ;;  %v2679_v18 = vld [vmem:[%s3566_s19] ss:$0 sm:$0xff] }
 0x933   : > { %v2034_v40 = vadd.f32 1e-05, %v2033_v39 }
 0x935   : > { %2680 = vrsqrt.f32 %v2034_v40  ;;  %vm2041_vm6 = vweird.f32 %v2034_v40 }
 0x93b   : > { %v2681_v33 = vpop.eup %2680 }
 0x93c   : > { %v2036_v36 = vmul.f32 %v2681_v33, %v2034_v40  ;;  %vm2042_vm5 = vweird.f32 %v2681_v33 }
 0x93d   : > { %vm2043_vm7 = vmor %vm2041_vm6, %vm2042_vm5 }
 0x93e   : > { %v2037_v14 = vmul.f32 %v2681_v33, %v2036_v36 }
 0x940   : > { %v2038_v62 = vmul.f32 0.5, %v2037_v14 }
 0x942   : > { %v2039_v45 = vsub.f32 1.5, %v2038_v62 }
 0x944   : > { %v2040_v24 = vmul.f32 %v2681_v33, %v2039_v45 }
 0x946   : > { %v2044_v50 = vsel %vm2043_vm7, %v2681_v33, %v2040_v24 }
 0x947   : > { %v2046_v51 = vrot.slane %v2044_v50, 1  ;;  %v2049_v55 = vmul.f32 %v2044_v50, %v2021_v3 }
 0x949   : > { %v2050_v54 = vmul.f32 %v2046_v51, %v2022_v29  ;;  %v2054_v59 = vmul.f32 %v2678_v49, %v2049_v55 }
 0x94b   : > { %v2055_v57 = vmul.f32 %v2678_v49, %v2050_v54  ;;  %v2059_v48 = vadd.f32 %v2679_v18, %v2054_v59 }
 0x94d   : > { %v2060_v58 = vadd.f32 %v2679_v18, %v2055_v57  ;;  %v2065_v60 = vpack.c.bf16 %v2059_v48, %v2059_v48 }
 0x94f   : > { %v2066_v1 = vpack.c.bf16 %v2060_v58, %v2060_v58  ;;  %v2069_v27 = vunpack.c.l.b16 %v2065_v60 }
 0x951   : > { %v2070_v53 = vunpack.c.l.b16 %v2066_v1 }
 0x953   : > { %v2071_v52 = vrot.slane %v2070_v53, 7 }
 0x955   : > { %v2072_v2 = vsel %vm2009_vm3, %v2071_v52, %v2069_v27 }
 0x956   : > { %v2073_v4 = vpack.c.b16 %v2072_v2, %v2072_v2 }
 0x958   : > { %2425 = vmatmul.msk.bf16.vlgmr.msra.gmra.mxu0 %vm750_vm1, %v2073_v4 }
 0x9d5   : > { %v2098_v6 = vpop.f32.mrf.mxu0 }
 0x9d6   : > { %v2103_v20 = vrot.slane %v2098_v6, 1  ;;  %2106 = vst.msk [vmem:[%s3014_s13] sm:$0x1] %vm2105_vm8, %v2098_v6 }
 0x9d8   : > { %2107 = vst.msk [vmem:[%s3014_s13 + $0x1] sm:$0x1] %vm2105_vm8, %v2103_v20 }
 0x9dd   : > { %v2100_v7 = vpop.f32.mrf.mxu0 }
 0x9de PF: > { %s3567_s23 = sld [smem:[#allocation18_spill]]  ;;  %s2120_s7 = sshll.u32 %s3014_s13, 4  ;;  %s2121_s7 = int_to_ptr.vmem [resolvable:$true] %s2120_s7 }
 0x9df   : > { %s3568_s29 = sld [smem:[#allocation27_spill]] }
 0x9e0   : > { %s3569_s14 = sld [smem:[#allocation7_spill]] }
 0x9e5   : > { %s2119_s3 = scalar_lea.hbm %s3568_s29, %s3567_s23  ;;  %s2702_s24 = scalar_lea.hbm %s3568_s29, 4 }
 0x9e6   : > { %s2122_s11 = sshll.u32 %s2119_s3, 4  ;;  %s3571_s17 = sand.u32 1, %s3569_s14   ;;  %s2123_s11 = int_to_ptr.hbm [resolvable:$true] %s2122_s11 }
 0x9e7   : > { %s2109_s22 = scalar_lea.sflag [#allocation4], %s3571_s17  ;;  %s2696_s5 = sshra.s32 %s2123_s11, 4  ;;  %s2697_s5 = int_to_ptr.hbm [resolvable:$true] %s2696_s5 }
 0x9e8   : > { %s2698_s16 = scalar_lea.hbm %s2697_s5, 2  ;;  %p2703_p6 = scmp.lt.s32.totalorder %s2697_s5, %s3568_s29 }
 0x9e9   : > { %p2699_p2 = scmp.ne.s32.totalorder %s2697_s5, %s2698_s16  ;;  %p2704_p7 = scmp.lt.s32.totalorder %s2702_s24, %s2698_s16 }
 0x9eb   : > { %p2700_p4 = pnand %p2699_p2, %p2926_p3  ;;  %p2705_p8 = por %p2704_p7, %p2703_p6 }
 0x9ed   : > { %p2701_p5 = pneg %p2700_p4 }
 0x9ef   : > { %p2706_p10 = pnand %p2705_p8, %p2701_p5 }
 0x9f1   : > { %2709 = shalt.err (!%p2706_p10)
}
 0x9f2   : > { %s2793_s13 = smov 1  }
 0x9f3   : > { %2451 = dma.vmem_to_hbm [thread:$0]  (%p2926_p3), %s2121_s7, 32, %s2123_s11, %s2109_s22, %s2791_s30, %s2791_s30, %s2793_s13  }
 0x9f4 PF: > { %s3572_s27 = sld [smem:[#allocation12_spill]] }
 0x9f5   : > { %s3573_s19 = sld [smem:[#allocation6_spill]] }
 0x9fa   : > { %p2457_p11 = scmp.ge.s32.totalorder %s3572_s27, 2 }
 0x9fb   : > { %s2137_s0 = sand.u32 1, %s3573_s19  }
 0x9fc   : > { %p2454_p12 = pnand %p2457_p11, %p2936_p9  ;;  %s2138_s18 = scalar_lea.sflag [#allocation4], %s2137_s0 }
 0x9fe   : > { %p2455_p13 = pneg %p2454_p12 }
 0xa00   : > { %2743 = dma.done.wait (%p2455_p13), %s2138_s18, 32  }
 0xa01   : > { %2745 = vsyncadd (%p2455_p13), %s2138_s18, 4294967264  ;;  %s29_s28 = sadd.s32 1, %s3572_s27   ;;  %s3575_s21 = sld [smem:[#allocation7_spill]] }
 0xa02   : > { %p26_p0 = scmp.ge.s32.totalorder %s29_s28, 6   ;;  %s3576_s22 = sld [smem:[#allocation8_spill]] }
 0xa03   : > { %s3577_s23 = sld [smem:[#allocation17_spill]] }
 0xa04   : > { %s3578_s24 = sld [smem:[#allocation10_spill]]  ;;  %28 = sbr.rel (!%p26_p0) target bundleno = 15 (0xf), region = 163 }
 0xa05   : > { %s3579_s25 = sld [smem:[#allocation11_spill]] }
 0xa06   : > { %s3580_s26 = sld [smem:[#allocation13_spill]] }
 0xa07   : > { %s3581_s27 = sld [smem:[#allocation15_spill]] }
 0xa09   :  { %2144 = vsyncpa [#allocation4], 1 }
 0xa0a   :  { %2146 = vsyncpa [#allocation4 + $0x1], 1 }

</bundles_post_ra>
